<compile_context>
chip_gen: v7x
topology: tpu7x:2x2x1
jax: 0.10.0
libtpu: 0.0.40
codegen_flags: <defaults>
</compile_context>

<pallas_src>
import functools
import math

import numpy as np
import jax
import jax.numpy as jnp
from jax import lax
from jax.experimental import pallas as pl
from jax.experimental.pallas import tpu as pltpu


# ----------------------------------------------------------------------------
# Fused Pallas kernel
# ----------------------------------------------------------------------------

def mswa3d_fused_kernel(
    x_ref,               # (1, C, N_sp) f32   NCDHW reshaped; channels on sublanes
    pqT_ref,             # (N_sp, Nq)  bf16   adaptive-avg-pool (q window), transposed
    pkT_ref,             # (N_sp, Nk)  bf16   stacked k-window pools, transposed
    peq_ref,             # (C, Nq)     f32    sine position embedding (q window)
    pek_ref,             # (C, Nk)     f32    sine position embedding (k windows)
    wq_ref, bq_ref,      # (C, C)  bf16 / (C, 1)  f32     q_lin
    wkv_ref, bkv_ref,    # (2C, C) bf16 / (2C, 1) f32     [k_lin ; v_lin] stacked
    w1_ref, b1_ref,      # (2C, C) bf16 / (2C, 1) f32     mlp.fc1
    w2_ref, b2_ref,      # (C, 2C) bf16 / (C, 1)  f32     mlp.fc2
    wc_ref, bc_ref,      # (C, C)  bf16 / (C, 1)  f32     out_conv (1x1)
    gamma_ref, beta_ref, # (C, 1)  f32                     GroupNorm affine
    gsum_ref,            # (C, C)  f32                     same-group indicator matrix
    interpT_ref,         # (Nq, N_sp) bf16  trilinear upsample (align_corners), transposed
    o_ref,               # (1, C, N_sp) f32
    attn_sc,             # scratch (C, Nq) f32  -- per-head outputs scattered by row
    *, heads, denom, eps=1e-5):
    f32 = jnp.float32
    bf16 = jnp.bfloat16

    x = x_ref[0]                                        # (C, N_sp) f32
    x_bf = x.astype(bf16)
    C = x.shape[0]
    dh = C // heads

    # ---- adaptive average pooling (q window + all k windows) ---------------
    pooled_q = jnp.dot(x_bf, pqT_ref[...], preferred_element_type=f32)   # (C, Nq)
    pooled_k = jnp.dot(x_bf, pkT_ref[...], preferred_element_type=f32)   # (C, Nk)

    qg_bf = (pooled_q + peq_ref[...]).astype(bf16)                        # (C, Nq)
    kg_bf = (pooled_k + pek_ref[...]).astype(bf16)                        # (C, Nk)

    # ---- Q / K / V projections: one matmul for Q, one for stacked K|V ------
    qfull = jnp.dot(wq_ref[...], qg_bf, preferred_element_type=f32) + bq_ref[...]     # (C, Nq)
    kvfull = jnp.dot(wkv_ref[...], kg_bf, preferred_element_type=f32) + bkv_ref[...]  # (2C, Nk)

    # ---- multi-head attention (reference defines self.scale but never uses it) ----
    for h in range(heads):
        lo = h * dh
        hi = lo + dh
        qh = qfull[lo:hi].astype(bf16)                 # (dh, Nq)
        kh = kvfull[lo:hi].astype(bf16)                # (dh, Nk)
        vh = kvfull[C + lo:C + hi].astype(bf16)        # (dh, Nk)
        s = lax.dot_general(qh, kh, (((0,), (0,)), ((), ())),
                            preferred_element_type=f32)                  # (Nq, Nk)
        s = s - jnp.max(s, axis=-1, keepdims=True)                        # f32 softmax
        e = jnp.exp(s)
        inv = pl.reciprocal(jnp.sum(e, axis=-1, keepdims=True), approx=True)  # EUP
        p = (e * inv).astype(bf16)
        oh = lax.dot_general(vh, p, (((1,), (1,)), ((), ())),
                             preferred_element_type=f32)                  # (dh, Nq)
        attn_sc[lo:hi, :] = oh                          # head h -> channels [h*dh, (h+1)*dh)

    # ---- residual + Mlp (1x1 conv MLP, ReLU; dropout = identity in eval) ---
    q_s = pooled_q + attn_sc[...]                                         # (C, Nq)
    h1 = jnp.dot(w1_ref[...], q_s.astype(bf16), preferred_element_type=f32) + b1_ref[...]
    h1 = jnp.maximum(h1, 0.0)
    mlp = jnp.dot(w2_ref[...], h1.astype(bf16), preferred_element_type=f32) + b2_ref[...]
    q_m = q_s + mlp                                                       # (C, Nq)

    # ---- out_conv (1x1) BEFORE the trilinear upsample (linear ops commute;
    #      interpolation weights sum to 1 so the bias commutes too) ----------
    y_small = jnp.dot(wc_ref[...], q_m.astype(bf16), preferred_element_type=f32) + bc_ref[...]
    y = jnp.dot(y_small.astype(bf16), interpT_ref[...],
                preferred_element_type=f32)                               # (C, N_sp)

    # ---- GroupNorm (two-pass statistics in f32) -----------------------------
    gsum = gsum_ref[...]                                                  # (C, C)
    grp_row = jnp.dot(gsum, y, preferred_element_type=f32)                # per-voxel group sums
    mean_c = jnp.sum(grp_row, axis=1, keepdims=True) / denom              # (C, 1)
    d = y - mean_c
    grp_sq = jnp.dot(gsum, d * d, preferred_element_type=f32)
    var_c = jnp.sum(grp_sq, axis=1, keepdims=True) / denom                # (C, 1) biased var
    yn = d * lax.rsqrt(var_c + eps) * gamma_ref[...] + beta_ref[...]

    # ---- shortcut + lane-dense store ----------------------------------------
    o_ref[0] = x + yn


# ----------------------------------------------------------------------------
# Host-side fixed matrices (adaptive pool / trilinear interp / pos-enc)
# ----------------------------------------------------------------------------

def adaptive_pool_matrix(in_size, out_size):
    P = np.zeros((out_size, in_size), np.float32)
    for i in range(out_size):
        start = (i * in_size) // out_size
        end = -((-(i + 1) * in_size) // out_size)    # ceil((i+1)*in/out)
        P[i, start:end] = 1.0 / (end - start)
    return P


def interp_matrix_align_corners(in_size, out_size):
    M = np.zeros((out_size, in_size), np.float32)
    if out_size == 1:
        M[0, 0] = 1.0
        return M
    for i in range(out_size):
        src = i * (in_size - 1) / (out_size - 1)
        i0 = int(math.floor(src))
        i1 = min(i0 + 1, in_size - 1)
        f = src - i0
        M[i, i0] += 1.0 - f
        M[i, i1] += f
    return M


def position_embedding_sine_3d(Xw, Yw, Zw, num_feats, temperature=10000.0):
    npf = num_feats // 3
    npfs = [npf, npf, num_feats - 2 * npf]
    zs = np.broadcast_to(np.arange(1, Xw + 1, dtype=np.float32)[:, None, None], (Xw, Yw, Zw))
    ys = np.broadcast_to(np.arange(1, Yw + 1, dtype=np.float32)[None, :, None], (Xw, Yw, Zw))
    xs = np.broadcast_to(np.arange(1, Zw + 1, dtype=np.float32)[None, None, :], (Xw, Yw, Zw))

    def make(embed, n):
        dim_t = temperature ** (2.0 * (np.arange(n, dtype=np.float32) // 2) / n)
        pos = embed[..., None] / dim_t
        return np.concatenate([np.sin(pos[..., 0::2]), np.cos(pos[..., 1::2])], axis=-1)

    pos_x = make(xs, npfs[0])
    pos_y = make(ys, npfs[1])
    pos_z = make(zs, npfs[2])
    pos = np.concatenate([pos_z, pos_y, pos_x], axis=-1)          # (Xw,Yw,Zw,C)
    return pos.reshape(Xw * Yw * Zw, num_feats).astype(np.float32)


def _full_spec(shape):
    zeros = (0,) * len(shape)
    return pl.BlockSpec(shape, lambda b, _z=zeros: _z)


# ----------------------------------------------------------------------------
# Wrapper
# ----------------------------------------------------------------------------

def mswa_3d_forward(x, params, heads=4,
                    window_size_q=(4, 4, 4),
                    window_size_k=((4, 4, 4), (2, 2, 2), (1, 1, 1))):
    B, C, X, Y, Z = x.shape
    N_sp = X * Y * Z
    x_cf = x.reshape(B, C, N_sp)            # pure reshape of NCDHW (no transpose)

    def pool_mat_3d(ws):
        return np.kron(adaptive_pool_matrix(X, ws[0]),
                       np.kron(adaptive_pool_matrix(Y, ws[1]),
                               adaptive_pool_matrix(Z, ws[2])))

    windows_k = [tuple(w) for w in window_size_k]
    Pq = pool_mat_3d(tuple(window_size_q))                        # (Nq, N_sp)
    Pk = np.concatenate([pool_mat_3d(w) for w in windows_k], 0)   # (Nk, N_sp)
    Nq, Nk = int(Pq.shape[0]), int(Pk.shape[0])
    pqT = jnp.asarray(Pq.T, dtype=jnp.bfloat16)
    pkT = jnp.asarray(Pk.T, dtype=jnp.bfloat16)

    peq = jnp.asarray(position_embedding_sine_3d(*window_size_q, C).T)         # (C, Nq)
    pek = jnp.asarray(np.concatenate(
        [position_embedding_sine_3d(*w, C).T for w in windows_k], axis=1))     # (C, Nk)

    W_interp = np.kron(interp_matrix_align_corners(window_size_q[0], X),
                       np.kron(interp_matrix_align_corners(window_size_q[1], Y),
                               interp_matrix_align_corners(window_size_q[2], Z)))
    interpT = jnp.asarray(W_interp.T, dtype=jnp.bfloat16)         # (Nq, N_sp)

    num_g = 8 if C > 8 else 2
    cg = C // num_g
    gsum_np = np.zeros((C, C), np.float32)
    for c in range(C):
        g = c // cg
        gsum_np[c, g * cg:(g + 1) * cg] = 1.0
    gsum = jnp.asarray(gsum_np)
    denom = float(cg * N_sp)

    bf = lambda a: a.astype(jnp.bfloat16)
    wq = bf(params["Wq"])
    bq = params["bq"].reshape(C, 1)
    wkv = bf(jnp.concatenate([params["Wk"], params["Wv"]], axis=0))          # (2C, C)
    bkv = jnp.concatenate([params["bk"], params["bv"]], axis=0).reshape(2 * C, 1)
    w1 = bf(params["W1"]); b1 = params["b1"].reshape(2 * C, 1)
    w2 = bf(params["W2"]); b2 = params["b2"].reshape(C, 1)
    wc = bf(params["Wc"]); bc = params["bc"].reshape(C, 1)
    gamma = params["gamma"].reshape(C, 1)
    beta = params["beta"].reshape(C, 1)

    out_cf = pl.pallas_call(
        functools.partial(mswa3d_fused_kernel, heads=heads, denom=denom),
        out_shape=jax.ShapeDtypeStruct((B, C, N_sp), jnp.float32),
        grid=(B,),
        in_specs=[
            pl.BlockSpec((1, C, N_sp), lambda b: (b, 0, 0)),
            _full_spec((N_sp, Nq)), _full_spec((N_sp, Nk)),
            _full_spec((C, Nq)), _full_spec((C, Nk)),
            _full_spec((C, C)), _full_spec((C, 1)),
            _full_spec((2 * C, C)), _full_spec((2 * C, 1)),
            _full_spec((2 * C, C)), _full_spec((2 * C, 1)),
            _full_spec((C, 2 * C)), _full_spec((C, 1)),
            _full_spec((C, C)), _full_spec((C, 1)),
            _full_spec((C, 1)), _full_spec((C, 1)),
            _full_spec((C, C)),
            _full_spec((Nq, N_sp)),
        ],
        out_specs=pl.BlockSpec((1, C, N_sp), lambda b: (b, 0, 0)),
        scratch_shapes=[pltpu.VMEM((C, Nq), jnp.float32)],
        compiler_params=pltpu.CompilerParams(
            dimension_semantics=("parallel",)),
    )(x_cf, pqT, pkT, peq, pek,
      wq, bq, wkv, bkv,
      w1, b1, w2, b2, wc, bc, gamma, beta,
      gsum, interpT)

    return out_cf.reshape(B, C, X, Y, Z)


# ----------------------------------------------------------------------------
# Main
# ----------------------------------------------------------------------------

if __name__ == "__main__":
    B, C, X, Y, Z = 2, 16, 8, 8, 8
    heads = 4

    key = jax.random.PRNGKey(0)
    keys = jax.random.split(key, 16)

    def init(k, shape, scale=0.1):
        return jax.random.normal(k, shape, dtype=jnp.float32) * scale

    x = jax.random.normal(keys[0], (B, C, X, Y, Z), dtype=jnp.float32)

    params = {
        # q/k/v Linear(dim, dim): weight stored PyTorch-style (out, in); bias (out,)
        "Wq": init(keys[1], (C, C)), "bq": init(keys[2], (C,)),
        "Wk": init(keys[3], (C, C)), "bk": init(keys[4], (C,)),
        "Wv": init(keys[5], (C, C)), "bv": init(keys[6], (C,)),
        # Mlp: Conv3d(C, 2C, 1) / Conv3d(2C, C, 1)
        "W1": init(keys[7], (2 * C, C)), "b1": init(keys[8], (2 * C,)),
        "W2": init(keys[9], (C, 2 * C)), "b2": init(keys[10], (C,)),
        # out_conv: Conv3d(C, C, 1) + GroupNorm(8, C) affine params
        "Wc": init(keys[11], (C, C)), "bc": init(keys[12], (C,)),
        "gamma": 1.0 + init(keys[13], (C,)), "beta": init(keys[14], (C,)),
    }
    # TODO(synk): nn.Dropout(p=0.1) layers are identity here (inference/eval mode).

    fwd = jax.jit(functools.partial(mswa_3d_forward, heads=heads))
    out = jax.block_until_ready(fwd(x, params))
    assert out.shape == (B, C, X, Y, Z)
    assert bool(jnp.all(jnp.isfinite(out)))
    print("KERNEL_OK")
</pallas_src>

<mosaic_0001>
module attributes {stable_mosaic.version = 11 : i64} {
  func.func @mswa3d_fused_kernel(%arg0: i32, %arg1: memref<1x16x512xf32, #tpu.memory_space<vmem>>, %arg2: memref<512x64xbf16, #tpu.memory_space<vmem>>, %arg3: memref<512x73xbf16, #tpu.memory_space<vmem>>, %arg4: memref<16x64xf32, #tpu.memory_space<vmem>>, %arg5: memref<16x73xf32, #tpu.memory_space<vmem>>, %arg6: memref<16x16xbf16, #tpu.memory_space<vmem>>, %arg7: memref<16x1xf32, #tpu.memory_space<vmem>>, %arg8: memref<32x16xbf16, #tpu.memory_space<vmem>>, %arg9: memref<32x1xf32, #tpu.memory_space<vmem>>, %arg10: memref<32x16xbf16, #tpu.memory_space<vmem>>, %arg11: memref<32x1xf32, #tpu.memory_space<vmem>>, %arg12: memref<16x32xbf16, #tpu.memory_space<vmem>>, %arg13: memref<16x1xf32, #tpu.memory_space<vmem>>, %arg14: memref<16x16xbf16, #tpu.memory_space<vmem>>, %arg15: memref<16x1xf32, #tpu.memory_space<vmem>>, %arg16: memref<16x1xf32, #tpu.memory_space<vmem>>, %arg17: memref<16x1xf32, #tpu.memory_space<vmem>>, %arg18: memref<16x16xf32, #tpu.memory_space<vmem>>, %arg19: memref<64x512xbf16, #tpu.memory_space<vmem>>, %arg20: memref<1x16x512xf32, #tpu.memory_space<vmem>>, %arg21: memref<16x64xf32, #tpu.memory_space<vmem>>) attributes {dimension_semantics = [#tpu.dimension_semantics<parallel>], iteration_bounds = array<i64: 2>, scalar_prefetch = 0 : i64, scratch_operands = 1 : i64, tpu.core_type = #tpu.core_type<tc>, window_params = [{transform_indices = @transform_0, window_bounds = array<i64: 1, 16, 512>}, {pipeline_mode = #tpu.pipeline_mode<synchronous>, transform_indices = @transform_1, window_bounds = array<i64: 512, 64>}, {pipeline_mode = #tpu.pipeline_mode<synchronous>, transform_indices = @transform_2, window_bounds = array<i64: 512, 73>}, {pipeline_mode = #tpu.pipeline_mode<synchronous>, transform_indices = @transform_3, window_bounds = array<i64: 16, 64>}, {pipeline_mode = #tpu.pipeline_mode<synchronous>, transform_indices = @transform_4, window_bounds = array<i64: 16, 73>}, {pipeline_mode = #tpu.pipeline_mode<synchronous>, transform_indices = @transform_5, window_bounds = array<i64: 16, 16>}, {pipeline_mode = #tpu.pipeline_mode<synchronous>, transform_indices = @transform_6, window_bounds = array<i64: 16, 1>}, {pipeline_mode = #tpu.pipeline_mode<synchronous>, transform_indices = @transform_7, window_bounds = array<i64: 32, 16>}, {pipeline_mode = #tpu.pipeline_mode<synchronous>, transform_indices = @transform_8, window_bounds = array<i64: 32, 1>}, {pipeline_mode = #tpu.pipeline_mode<synchronous>, transform_indices = @transform_9, window_bounds = array<i64: 32, 16>}, {pipeline_mode = #tpu.pipeline_mode<synchronous>, transform_indices = @transform_10, window_bounds = array<i64: 32, 1>}, {pipeline_mode = #tpu.pipeline_mode<synchronous>, transform_indices = @transform_11, window_bounds = array<i64: 16, 32>}, {pipeline_mode = #tpu.pipeline_mode<synchronous>, transform_indices = @transform_12, window_bounds = array<i64: 16, 1>}, {pipeline_mode = #tpu.pipeline_mode<synchronous>, transform_indices = @transform_13, window_bounds = array<i64: 16, 16>}, {pipeline_mode = #tpu.pipeline_mode<synchronous>, transform_indices = @transform_14, window_bounds = array<i64: 16, 1>}, {pipeline_mode = #tpu.pipeline_mode<synchronous>, transform_indices = @transform_15, window_bounds = array<i64: 16, 1>}, {pipeline_mode = #tpu.pipeline_mode<synchronous>, transform_indices = @transform_16, window_bounds = array<i64: 16, 1>}, {pipeline_mode = #tpu.pipeline_mode<synchronous>, transform_indices = @transform_17, window_bounds = array<i64: 16, 16>}, {pipeline_mode = #tpu.pipeline_mode<synchronous>, transform_indices = @transform_18, window_bounds = array<i64: 64, 512>}, {transform_indices = @transform_19, window_bounds = array<i64: 1, 16, 512>}]} {
    %c0 = arith.constant 0 : index
    %c0_0 = arith.constant 0 : index
    %c0_1 = arith.constant 0 : index
    %0 = vector.load %arg1[%c0, %c0_0, %c0_1] : memref<1x16x512xf32, #tpu.memory_space<vmem>>, vector<1x16x512xf32>
    %1 = vector.shape_cast %0 : vector<1x16x512xf32> to vector<16x512xf32>
    %2 = arith.truncf %1 : vector<16x512xf32> to vector<16x512xbf16>
    %c0_2 = arith.constant 0 : index
    %c0_3 = arith.constant 0 : index
    %3 = vector.load %arg2[%c0_2, %c0_3] : memref<512x64xbf16, #tpu.memory_space<vmem>>, vector<512x64xbf16>
    %cst = arith.constant dense<0.000000e+00> : vector<16x64xf32>
    %4 = tpu.matmul %2, %3, %cst {dimension_numbers = #tpu.dot_dimension_numbers<[1], [0], [0], [1], [0, 0, 1, 1], [], []>} : vector<16x512xbf16>, vector<512x64xbf16>, vector<16x64xf32> -> vector<16x64xf32>
    %c0_4 = arith.constant 0 : index
    %c0_5 = arith.constant 0 : index
    %5 = vector.load %arg3[%c0_4, %c0_5] : memref<512x73xbf16, #tpu.memory_space<vmem>>, vector<512x73xbf16>
    %cst_6 = arith.constant dense<0.000000e+00> : vector<16x73xf32>
    %6 = tpu.matmul %2, %5, %cst_6 {dimension_numbers = #tpu.dot_dimension_numbers<[1], [0], [0], [1], [0, 0, 1, 1], [], []>} : vector<16x512xbf16>, vector<512x73xbf16>, vector<16x73xf32> -> vector<16x73xf32>
    %c0_7 = arith.constant 0 : index
    %c0_8 = arith.constant 0 : index
    %7 = vector.load %arg4[%c0_7, %c0_8] : memref<16x64xf32, #tpu.memory_space<vmem>>, vector<16x64xf32>
    %8 = arith.addf %4, %7 : vector<16x64xf32>
    %9 = arith.truncf %8 : vector<16x64xf32> to vector<16x64xbf16>
    %c0_9 = arith.constant 0 : index
    %c0_10 = arith.constant 0 : index
    %10 = vector.load %arg5[%c0_9, %c0_10] : memref<16x73xf32, #tpu.memory_space<vmem>>, vector<16x73xf32>
    %11 = arith.addf %6, %10 : vector<16x73xf32>
    %12 = arith.truncf %11 : vector<16x73xf32> to vector<16x73xbf16>
    %c0_11 = arith.constant 0 : index
    %c0_12 = arith.constant 0 : index
    %13 = vector.load %arg6[%c0_11, %c0_12] : memref<16x16xbf16, #tpu.memory_space<vmem>>, vector<16x16xbf16>
    %cst_13 = arith.constant dense<0.000000e+00> : vector<16x64xf32>
    %14 = tpu.matmul %13, %9, %cst_13 {dimension_numbers = #tpu.dot_dimension_numbers<[1], [0], [0], [1], [0, 0, 1, 1], [], []>} : vector<16x16xbf16>, vector<16x64xbf16>, vector<16x64xf32> -> vector<16x64xf32>
    %c0_14 = arith.constant 0 : index
    %c0_15 = arith.constant 0 : index
    %15 = vector.load %arg7[%c0_14, %c0_15] : memref<16x1xf32, #tpu.memory_space<vmem>>, vector<16x1xf32>
    %16 = vector.broadcast %15 : vector<16x1xf32> to vector<16x64xf32>
    %17 = arith.addf %14, %16 : vector<16x64xf32>
    %c0_16 = arith.constant 0 : index
    %c0_17 = arith.constant 0 : index
    %18 = vector.load %arg8[%c0_16, %c0_17] : memref<32x16xbf16, #tpu.memory_space<vmem>>, vector<32x16xbf16>
    %cst_18 = arith.constant dense<0.000000e+00> : vector<32x73xf32>
    %19 = tpu.matmul %18, %12, %cst_18 {dimension_numbers = #tpu.dot_dimension_numbers<[1], [0], [0], [1], [0, 0, 1, 1], [], []>} : vector<32x16xbf16>, vector<16x73xbf16>, vector<32x73xf32> -> vector<32x73xf32>
    %c0_19 = arith.constant 0 : index
    %c0_20 = arith.constant 0 : index
    %20 = vector.load %arg9[%c0_19, %c0_20] : memref<32x1xf32, #tpu.memory_space<vmem>>, vector<32x1xf32>
    %21 = vector.broadcast %20 : vector<32x1xf32> to vector<32x73xf32>
    %22 = arith.addf %19, %21 : vector<32x73xf32>
    %23 = vector.extract_strided_slice %17 {offsets = [0, 0], sizes = [4, 64], strides = [1, 1]} : vector<16x64xf32> to vector<4x64xf32>
    %24 = arith.truncf %23 : vector<4x64xf32> to vector<4x64xbf16>
    %25 = vector.extract_strided_slice %22 {offsets = [0, 0], sizes = [4, 73], strides = [1, 1]} : vector<32x73xf32> to vector<4x73xf32>
    %26 = arith.truncf %25 : vector<4x73xf32> to vector<4x73xbf16>
    %27 = vector.extract_strided_slice %22 {offsets = [16, 0], sizes = [4, 73], strides = [1, 1]} : vector<32x73xf32> to vector<4x73xf32>
    %28 = arith.truncf %27 : vector<4x73xf32> to vector<4x73xbf16>
    %cst_21 = arith.constant dense<0.000000e+00> : vector<64x73xf32>
    %29 = tpu.matmul %24, %26, %cst_21 {dimension_numbers = #tpu.dot_dimension_numbers<[0], [0], [1], [1], [0, 1, 1, 1], [], []>} : vector<4x64xbf16>, vector<4x73xbf16>, vector<64x73xf32> -> vector<64x73xf32>
    %cst_22 = arith.constant dense<0xFF800000> : vector<64xf32>
    %30 = vector.multi_reduction <maximumf>, %29, %cst_22 [1] : vector<64x73xf32> to vector<64xf32>
    %31 = vector.shape_cast %30 : vector<64xf32> to vector<64x1xf32>
    %32 = vector.broadcast %31 : vector<64x1xf32> to vector<64x73xf32>
    %33 = arith.subf %29, %32 : vector<64x73xf32>
    %34 = math.exp %33 : vector<64x73xf32>
    %cst_23 = arith.constant dense<0.000000e+00> : vector<64xf32>
    %35 = vector.multi_reduction <add>, %34, %cst_23 [1] : vector<64x73xf32> to vector<64xf32>
    %36 = vector.shape_cast %35 : vector<64xf32> to vector<64x1xf32>
    %37 = tpu.reciprocal %36 {approx = true} : vector<64x1xf32> -> vector<64x1xf32>
    %38 = vector.broadcast %37 : vector<64x1xf32> to vector<64x73xf32>
    %39 = arith.mulf %34, %38 : vector<64x73xf32>
    %40 = arith.truncf %39 : vector<64x73xf32> to vector<64x73xbf16>
    %cst_24 = arith.constant dense<0.000000e+00> : vector<4x64xf32>
    %41 = tpu.matmul %28, %40, %cst_24 {dimension_numbers = #tpu.dot_dimension_numbers<[1], [1], [0], [0], [0, 0, 1, 0], [], []>} : vector<4x73xbf16>, vector<64x73xbf16>, vector<4x64xf32> -> vector<4x64xf32>
    %c0_25 = arith.constant 0 : index
    %c0_26 = arith.constant 0 : index
    %42 = vector.load %arg21[%c0_25, %c0_26] : memref<16x64xf32, #tpu.memory_space<vmem>>, vector<4x64xf32>
    tpu.vector_store %arg21[%c0_25, %c0_26], %41 {strides = array<i32>} : memref<16x64xf32, #tpu.memory_space<vmem>>, vector<4x64xf32>,
    %43 = vector.extract_strided_slice %17 {offsets = [4, 0], sizes = [4, 64], strides = [1, 1]} : vector<16x64xf32> to vector<4x64xf32>
    %44 = arith.truncf %43 : vector<4x64xf32> to vector<4x64xbf16>
    %45 = vector.extract_strided_slice %22 {offsets = [4, 0], sizes = [4, 73], strides = [1, 1]} : vector<32x73xf32> to vector<4x73xf32>
    %46 = arith.truncf %45 : vector<4x73xf32> to vector<4x73xbf16>
    %47 = vector.extract_strided_slice %22 {offsets = [20, 0], sizes = [4, 73], strides = [1, 1]} : vector<32x73xf32> to vector<4x73xf32>
    %48 = arith.truncf %47 : vector<4x73xf32> to vector<4x73xbf16>
    %cst_27 = arith.constant dense<0.000000e+00> : vector<64x73xf32>
    %49 = tpu.matmul %44, %46, %cst_27 {dimension_numbers = #tpu.dot_dimension_numbers<[0], [0], [1], [1], [0, 1, 1, 1], [], []>} : vector<4x64xbf16>, vector<4x73xbf16>, vector<64x73xf32> -> vector<64x73xf32>
    %cst_28 = arith.constant dense<0xFF800000> : vector<64xf32>
    %50 = vector.multi_reduction <maximumf>, %49, %cst_28 [1] : vector<64x73xf32> to vector<64xf32>
    %51 = vector.shape_cast %50 : vector<64xf32> to vector<64x1xf32>
    %52 = vector.broadcast %51 : vector<64x1xf32> to vector<64x73xf32>
    %53 = arith.subf %49, %52 : vector<64x73xf32>
    %54 = math.exp %53 : vector<64x73xf32>
    %cst_29 = arith.constant dense<0.000000e+00> : vector<64xf32>
    %55 = vector.multi_reduction <add>, %54, %cst_29 [1] : vector<64x73xf32> to vector<64xf32>
    %56 = vector.shape_cast %55 : vector<64xf32> to vector<64x1xf32>
    %57 = tpu.reciprocal %56 {approx = true} : vector<64x1xf32> -> vector<64x1xf32>
    %58 = vector.broadcast %57 : vector<64x1xf32> to vector<64x73xf32>
    %59 = arith.mulf %54, %58 : vector<64x73xf32>
    %60 = arith.truncf %59 : vector<64x73xf32> to vector<64x73xbf16>
    %cst_30 = arith.constant dense<0.000000e+00> : vector<4x64xf32>
    %61 = tpu.matmul %48, %60, %cst_30 {dimension_numbers = #tpu.dot_dimension_numbers<[1], [1], [0], [0], [0, 0, 1, 0], [], []>} : vector<4x73xbf16>, vector<64x73xbf16>, vector<4x64xf32> -> vector<4x64xf32>
    %c4 = arith.constant 4 : index
    %c0_31 = arith.constant 0 : index
    %62 = vector.load %arg21[%c4, %c0_31] : memref<16x64xf32, #tpu.memory_space<vmem>>, vector<4x64xf32>
    tpu.vector_store %arg21[%c4, %c0_31], %61 {strides = array<i32>} : memref<16x64xf32, #tpu.memory_space<vmem>>, vector<4x64xf32>,
    %63 = vector.extract_strided_slice %17 {offsets = [8, 0], sizes = [4, 64], strides = [1, 1]} : vector<16x64xf32> to vector<4x64xf32>
    %64 = arith.truncf %63 : vector<4x64xf32> to vector<4x64xbf16>
    %65 = vector.extract_strided_slice %22 {offsets = [8, 0], sizes = [4, 73], strides = [1, 1]} : vector<32x73xf32> to vector<4x73xf32>
    %66 = arith.truncf %65 : vector<4x73xf32> to vector<4x73xbf16>
    %67 = vector.extract_strided_slice %22 {offsets = [24, 0], sizes = [4, 73], strides = [1, 1]} : vector<32x73xf32> to vector<4x73xf32>
    %68 = arith.truncf %67 : vector<4x73xf32> to vector<4x73xbf16>
    %cst_32 = arith.constant dense<0.000000e+00> : vector<64x73xf32>
    %69 = tpu.matmul %64, %66, %cst_32 {dimension_numbers = #tpu.dot_dimension_numbers<[0], [0], [1], [1], [0, 1, 1, 1], [], []>} : vector<4x64xbf16>, vector<4x73xbf16>, vector<64x73xf32> -> vector<64x73xf32>
    %cst_33 = arith.constant dense<0xFF800000> : vector<64xf32>
    %70 = vector.multi_reduction <maximumf>, %69, %cst_33 [1] : vector<64x73xf32> to vector<64xf32>
    %71 = vector.shape_cast %70 : vector<64xf32> to vector<64x1xf32>
    %72 = vector.broadcast %71 : vector<64x1xf32> to vector<64x73xf32>
    %73 = arith.subf %69, %72 : vector<64x73xf32>
    %74 = math.exp %73 : vector<64x73xf32>
    %cst_34 = arith.constant dense<0.000000e+00> : vector<64xf32>
    %75 = vector.multi_reduction <add>, %74, %cst_34 [1] : vector<64x73xf32> to vector<64xf32>
    %76 = vector.shape_cast %75 : vector<64xf32> to vector<64x1xf32>
    %77 = tpu.reciprocal %76 {approx = true} : vector<64x1xf32> -> vector<64x1xf32>
    %78 = vector.broadcast %77 : vector<64x1xf32> to vector<64x73xf32>
    %79 = arith.mulf %74, %78 : vector<64x73xf32>
    %80 = arith.truncf %79 : vector<64x73xf32> to vector<64x73xbf16>
    %cst_35 = arith.constant dense<0.000000e+00> : vector<4x64xf32>
    %81 = tpu.matmul %68, %80, %cst_35 {dimension_numbers = #tpu.dot_dimension_numbers<[1], [1], [0], [0], [0, 0, 1, 0], [], []>} : vector<4x73xbf16>, vector<64x73xbf16>, vector<4x64xf32> -> vector<4x64xf32>
    %c8 = arith.constant 8 : index
    %c0_36 = arith.constant 0 : index
    %82 = vector.load %arg21[%c8, %c0_36] : memref<16x64xf32, #tpu.memory_space<vmem>>, vector<4x64xf32>
    tpu.vector_store %arg21[%c8, %c0_36], %81 {strides = array<i32>} : memref<16x64xf32, #tpu.memory_space<vmem>>, vector<4x64xf32>,
    %83 = vector.extract_strided_slice %17 {offsets = [12, 0], sizes = [4, 64], strides = [1, 1]} : vector<16x64xf32> to vector<4x64xf32>
    %84 = arith.truncf %83 : vector<4x64xf32> to vector<4x64xbf16>
    %85 = vector.extract_strided_slice %22 {offsets = [12, 0], sizes = [4, 73], strides = [1, 1]} : vector<32x73xf32> to vector<4x73xf32>
    %86 = arith.truncf %85 : vector<4x73xf32> to vector<4x73xbf16>
    %87 = vector.extract_strided_slice %22 {offsets = [28, 0], sizes = [4, 73], strides = [1, 1]} : vector<32x73xf32> to vector<4x73xf32>
    %88 = arith.truncf %87 : vector<4x73xf32> to vector<4x73xbf16>
    %cst_37 = arith.constant dense<0.000000e+00> : vector<64x73xf32>
    %89 = tpu.matmul %84, %86, %cst_37 {dimension_numbers = #tpu.dot_dimension_numbers<[0], [0], [1], [1], [0, 1, 1, 1], [], []>} : vector<4x64xbf16>, vector<4x73xbf16>, vector<64x73xf32> -> vector<64x73xf32>
    %cst_38 = arith.constant dense<0xFF800000> : vector<64xf32>
    %90 = vector.multi_reduction <maximumf>, %89, %cst_38 [1] : vector<64x73xf32> to vector<64xf32>
    %91 = vector.shape_cast %90 : vector<64xf32> to vector<64x1xf32>
    %92 = vector.broadcast %91 : vector<64x1xf32> to vector<64x73xf32>
    %93 = arith.subf %89, %92 : vector<64x73xf32>
    %94 = math.exp %93 : vector<64x73xf32>
    %cst_39 = arith.constant dense<0.000000e+00> : vector<64xf32>
    %95 = vector.multi_reduction <add>, %94, %cst_39 [1] : vector<64x73xf32> to vector<64xf32>
    %96 = vector.shape_cast %95 : vector<64xf32> to vector<64x1xf32>
    %97 = tpu.reciprocal %96 {approx = true} : vector<64x1xf32> -> vector<64x1xf32>
    %98 = vector.broadcast %97 : vector<64x1xf32> to vector<64x73xf32>
    %99 = arith.mulf %94, %98 : vector<64x73xf32>
    %100 = arith.truncf %99 : vector<64x73xf32> to vector<64x73xbf16>
    %cst_40 = arith.constant dense<0.000000e+00> : vector<4x64xf32>
    %101 = tpu.matmul %88, %100, %cst_40 {dimension_numbers = #tpu.dot_dimension_numbers<[1], [1], [0], [0], [0, 0, 1, 0], [], []>} : vector<4x73xbf16>, vector<64x73xbf16>, vector<4x64xf32> -> vector<4x64xf32>
    %c12 = arith.constant 12 : index
    %c0_41 = arith.constant 0 : index
    %102 = vector.load %arg21[%c12, %c0_41] : memref<16x64xf32, #tpu.memory_space<vmem>>, vector<4x64xf32>
    tpu.vector_store %arg21[%c12, %c0_41], %101 {strides = array<i32>} : memref<16x64xf32, #tpu.memory_space<vmem>>, vector<4x64xf32>,
    %c0_42 = arith.constant 0 : index
    %c0_43 = arith.constant 0 : index
    %103 = vector.load %arg21[%c0_42, %c0_43] : memref<16x64xf32, #tpu.memory_space<vmem>>, vector<16x64xf32>
    %104 = arith.addf %4, %103 : vector<16x64xf32>
    %c0_44 = arith.constant 0 : index
    %c0_45 = arith.constant 0 : index
    %105 = vector.load %arg10[%c0_44, %c0_45] : memref<32x16xbf16, #tpu.memory_space<vmem>>, vector<32x16xbf16>
    %106 = arith.truncf %104 : vector<16x64xf32> to vector<16x64xbf16>
    %cst_46 = arith.constant dense<0.000000e+00> : vector<32x64xf32>
    %107 = tpu.matmul %105, %106, %cst_46 {dimension_numbers = #tpu.dot_dimension_numbers<[1], [0], [0], [1], [0, 0, 1, 1], [], []>} : vector<32x16xbf16>, vector<16x64xbf16>, vector<32x64xf32> -> vector<32x64xf32>
    %c0_47 = arith.constant 0 : index
    %c0_48 = arith.constant 0 : index
    %108 = vector.load %arg11[%c0_47, %c0_48] : memref<32x1xf32, #tpu.memory_space<vmem>>, vector<32x1xf32>
    %109 = vector.broadcast %108 : vector<32x1xf32> to vector<32x64xf32>
    %110 = arith.addf %107, %109 : vector<32x64xf32>
    %cst_49 = arith.constant 0.000000e+00 : f32
    %111 = vector.broadcast %cst_49 : f32 to vector<32x64xf32>
    %112 = arith.maximumf %110, %111 : vector<32x64xf32>
    %c0_50 = arith.constant 0 : index
    %c0_51 = arith.constant 0 : index
    %113 = vector.load %arg12[%c0_50, %c0_51] : memref<16x32xbf16, #tpu.memory_space<vmem>>, vector<16x32xbf16>
    %114 = arith.truncf %112 : vector<32x64xf32> to vector<32x64xbf16>
    %cst_52 = arith.constant dense<0.000000e+00> : vector<16x64xf32>
    %115 = tpu.matmul %113, %114, %cst_52 {dimension_numbers = #tpu.dot_dimension_numbers<[1], [0], [0], [1], [0, 0, 1, 1], [], []>} : vector<16x32xbf16>, vector<32x64xbf16>, vector<16x64xf32> -> vector<16x64xf32>
    %c0_53 = arith.constant 0 : index
    %c0_54 = arith.constant 0 : index
    %116 = vector.load %arg13[%c0_53, %c0_54] : memref<16x1xf32, #tpu.memory_space<vmem>>, vector<16x1xf32>
    %117 = vector.broadcast %116 : vector<16x1xf32> to vector<16x64xf32>
    %118 = arith.addf %115, %117 : vector<16x64xf32>
    %119 = arith.addf %104, %118 : vector<16x64xf32>
    %c0_55 = arith.constant 0 : index
    %c0_56 = arith.constant 0 : index
    %120 = vector.load %arg14[%c0_55, %c0_56] : memref<16x16xbf16, #tpu.memory_space<vmem>>, vector<16x16xbf16>
    %121 = arith.truncf %119 : vector<16x64xf32> to vector<16x64xbf16>
    %cst_57 = arith.constant dense<0.000000e+00> : vector<16x64xf32>
    %122 = tpu.matmul %120, %121, %cst_57 {dimension_numbers = #tpu.dot_dimension_numbers<[1], [0], [0], [1], [0, 0, 1, 1], [], []>} : vector<16x16xbf16>, vector<16x64xbf16>, vector<16x64xf32> -> vector<16x64xf32>
    %c0_58 = arith.constant 0 : index
    %c0_59 = arith.constant 0 : index
    %123 = vector.load %arg15[%c0_58, %c0_59] : memref<16x1xf32, #tpu.memory_space<vmem>>, vector<16x1xf32>
    %124 = vector.broadcast %123 : vector<16x1xf32> to vector<16x64xf32>
    %125 = arith.addf %122, %124 : vector<16x64xf32>
    %126 = arith.truncf %125 : vector<16x64xf32> to vector<16x64xbf16>
    %c0_60 = arith.constant 0 : index
    %c0_61 = arith.constant 0 : index
    %127 = vector.load %arg19[%c0_60, %c0_61] : memref<64x512xbf16, #tpu.memory_space<vmem>>, vector<64x512xbf16>
    %cst_62 = arith.constant dense<0.000000e+00> : vector<16x512xf32>
    %128 = tpu.matmul %126, %127, %cst_62 {dimension_numbers = #tpu.dot_dimension_numbers<[1], [0], [0], [1], [0, 0, 1, 1], [], []>} : vector<16x64xbf16>, vector<64x512xbf16>, vector<16x512xf32> -> vector<16x512xf32>
    %c0_63 = arith.constant 0 : index
    %c0_64 = arith.constant 0 : index
    %129 = vector.load %arg18[%c0_63, %c0_64] : memref<16x16xf32, #tpu.memory_space<vmem>>, vector<16x16xf32>
    %cst_65 = arith.constant dense<0.000000e+00> : vector<16x512xf32>
    %130 = tpu.matmul %129, %128, %cst_65 {dimension_numbers = #tpu.dot_dimension_numbers<[1], [0], [0], [1], [0, 0, 1, 1], [], []>} : vector<16x16xf32>, vector<16x512xf32>, vector<16x512xf32> -> vector<16x512xf32>
    %cst_66 = arith.constant dense<0.000000e+00> : vector<16xf32>
    %131 = vector.multi_reduction <add>, %130, %cst_66 [1] : vector<16x512xf32> to vector<16xf32>
    %132 = vector.shape_cast %131 : vector<16xf32> to vector<16x1xf32>
    %cst_67 = arith.constant 1.024000e+03 : f32
    %133 = vector.broadcast %cst_67 : f32 to vector<16x1xf32>
    %134 = arith.divf %132, %133 : vector<16x1xf32>
    %135 = vector.broadcast %134 : vector<16x1xf32> to vector<16x512xf32>
    %136 = arith.subf %128, %135 : vector<16x512xf32>
    %137 = arith.mulf %136, %136 : vector<16x512xf32>
    %cst_68 = arith.constant dense<0.000000e+00> : vector<16x512xf32>
    %138 = tpu.matmul %129, %137, %cst_68 {dimension_numbers = #tpu.dot_dimension_numbers<[1], [0], [0], [1], [0, 0, 1, 1], [], []>} : vector<16x16xf32>, vector<16x512xf32>, vector<16x512xf32> -> vector<16x512xf32>
    %cst_69 = arith.constant dense<0.000000e+00> : vector<16xf32>
    %139 = vector.multi_reduction <add>, %138, %cst_69 [1] : vector<16x512xf32> to vector<16xf32>
    %140 = vector.shape_cast %139 : vector<16xf32> to vector<16x1xf32>
    %cst_70 = arith.constant 1.024000e+03 : f32
    %141 = vector.broadcast %cst_70 : f32 to vector<16x1xf32>
    %142 = arith.divf %140, %141 : vector<16x1xf32>
    %cst_71 = arith.constant 9.99999974E-6 : f32
    %143 = vector.broadcast %cst_71 : f32 to vector<16x1xf32>
    %144 = arith.addf %142, %143 : vector<16x1xf32>
    %145 = math.rsqrt %144 : vector<16x1xf32>
    %146 = vector.broadcast %145 : vector<16x1xf32> to vector<16x512xf32>
    %147 = arith.mulf %136, %146 : vector<16x512xf32>
    %c0_72 = arith.constant 0 : index
    %c0_73 = arith.constant 0 : index
    %148 = vector.load %arg16[%c0_72, %c0_73] : memref<16x1xf32, #tpu.memory_space<vmem>>, vector<16x1xf32>
    %149 = vector.broadcast %148 : vector<16x1xf32> to vector<16x512xf32>
    %150 = arith.mulf %147, %149 : vector<16x512xf32>
    %c0_74 = arith.constant 0 : index
    %c0_75 = arith.constant 0 : index
    %151 = vector.load %arg17[%c0_74, %c0_75] : memref<16x1xf32, #tpu.memory_space<vmem>>, vector<16x1xf32>
    %152 = vector.broadcast %151 : vector<16x1xf32> to vector<16x512xf32>
    %153 = arith.addf %150, %152 : vector<16x512xf32>
    %154 = arith.addf %1, %153 : vector<16x512xf32>
    %c0_76 = arith.constant 0 : index
    %c0_77 = arith.constant 0 : index
    %c0_78 = arith.constant 0 : index
    %155 = vector.load %arg20[%c0_76, %c0_77, %c0_78] : memref<1x16x512xf32, #tpu.memory_space<vmem>>, vector<1x16x512xf32>
    %156 = vector.shape_cast %155 : vector<1x16x512xf32> to vector<16x512xf32>
    %157 = vector.shape_cast %154 : vector<16x512xf32> to vector<1x16x512xf32>
    tpu.vector_store %arg20[%c0_76, %c0_77, %c0_78], %157 {strides = array<i32>} : memref<1x16x512xf32, #tpu.memory_space<vmem>>, vector<1x16x512xf32>,
    return
  }
  func.func @transform_0(%arg0: i32) -> (i32, i32, i32) {
    %c0_i32 = arith.constant 0 : i32
    %c0_i32_0 = arith.constant 0 : i32
    %c0_i32_1 = arith.constant 0 : i32
    return %arg0, %c0_i32, %c0_i32_0 : i32, i32, i32
  }
  func.func @transform_1(%arg0: i32) -> (i32, i32) {
    %c0_i32 = arith.constant 0 : i32
    %c0_i32_0 = arith.constant 0 : i32
    %c0_i32_1 = arith.constant 0 : i32
    return %c0_i32, %c0_i32_0 : i32, i32
  }
  func.func @transform_2(%arg0: i32) -> (i32, i32) {
    %c0_i32 = arith.constant 0 : i32
    %c0_i32_0 = arith.constant 0 : i32
    %c0_i32_1 = arith.constant 0 : i32
    return %c0_i32, %c0_i32_0 : i32, i32
  }
  func.func @transform_3(%arg0: i32) -> (i32, i32) {
    %c0_i32 = arith.constant 0 : i32
    %c0_i32_0 = arith.constant 0 : i32
    %c0_i32_1 = arith.constant 0 : i32
    return %c0_i32, %c0_i32_0 : i32, i32
  }
  func.func @transform_4(%arg0: i32) -> (i32, i32) {
    %c0_i32 = arith.constant 0 : i32
    %c0_i32_0 = arith.constant 0 : i32
    %c0_i32_1 = arith.constant 0 : i32
    return %c0_i32, %c0_i32_0 : i32, i32
  }
  func.func @transform_5(%arg0: i32) -> (i32, i32) {
    %c0_i32 = arith.constant 0 : i32
    %c0_i32_0 = arith.constant 0 : i32
    %c0_i32_1 = arith.constant 0 : i32
    return %c0_i32, %c0_i32_0 : i32, i32
  }
  func.func @transform_6(%arg0: i32) -> (i32, i32) {
    %c0_i32 = arith.constant 0 : i32
    %c0_i32_0 = arith.constant 0 : i32
    %c0_i32_1 = arith.constant 0 : i32
    return %c0_i32, %c0_i32_0 : i32, i32
  }
  func.func @transform_7(%arg0: i32) -> (i32, i32) {
    %c0_i32 = arith.constant 0 : i32
    %c0_i32_0 = arith.constant 0 : i32
    %c0_i32_1 = arith.constant 0 : i32
    return %c0_i32, %c0_i32_0 : i32, i32
  }
  func.func @transform_8(%arg0: i32) -> (i32, i32) {
    %c0_i32 = arith.constant 0 : i32
    %c0_i32_0 = arith.constant 0 : i32
    %c0_i32_1 = arith.constant 0 : i32
    return %c0_i32, %c0_i32_0 : i32, i32
  }
  func.func @transform_9(%arg0: i32) -> (i32, i32) {
    %c0_i32 = arith.constant 0 : i32
    %c0_i32_0 = arith.constant 0 : i32
    %c0_i32_1 = arith.constant 0 : i32
    return %c0_i32, %c0_i32_0 : i32, i32
  }
  func.func @transform_10(%arg0: i32) -> (i32, i32) {
    %c0_i32 = arith.constant 0 : i32
    %c0_i32_0 = arith.constant 0 : i32
    %c0_i32_1 = arith.constant 0 : i32
    return %c0_i32, %c0_i32_0 : i32, i32
  }
  func.func @transform_11(%arg0: i32) -> (i32, i32) {
    %c0_i32 = arith.constant 0 : i32
    %c0_i32_0 = arith.constant 0 : i32
    %c0_i32_1 = arith.constant 0 : i32
    return %c0_i32, %c0_i32_0 : i32, i32
  }
  func.func @transform_12(%arg0: i32) -> (i32, i32) {
    %c0_i32 = arith.constant 0 : i32
    %c0_i32_0 = arith.constant 0 : i32
    %c0_i32_1 = arith.constant 0 : i32
    return %c0_i32, %c0_i32_0 : i32, i32
  }
  func.func @transform_13(%arg0: i32) -> (i32, i32) {
    %c0_i32 = arith.constant 0 : i32
    %c0_i32_0 = arith.constant 0 : i32
    %c0_i32_1 = arith.constant 0 : i32
    return %c0_i32, %c0_i32_0 : i32, i32
  }
  func.func @transform_14(%arg0: i32) -> (i32, i32) {
    %c0_i32 = arith.constant 0 : i32
    %c0_i32_0 = arith.constant 0 : i32
    %c0_i32_1 = arith.constant 0 : i32
    return %c0_i32, %c0_i32_0 : i32, i32
  }
  func.func @transform_15(%arg0: i32) -> (i32, i32) {
    %c0_i32 = arith.constant 0 : i32
    %c0_i32_0 = arith.constant 0 : i32
    %c0_i32_1 = arith.constant 0 : i32
    return %c0_i32, %c0_i32_0 : i32, i32
  }
  func.func @transform_16(%arg0: i32) -> (i32, i32) {
    %c0_i32 = arith.constant 0 : i32
    %c0_i32_0 = arith.constant 0 : i32
    %c0_i32_1 = arith.constant 0 : i32
    return %c0_i32, %c0_i32_0 : i32, i32
  }
  func.func @transform_17(%arg0: i32) -> (i32, i32) {
    %c0_i32 = arith.constant 0 : i32
    %c0_i32_0 = arith.constant 0 : i32
    %c0_i32_1 = arith.constant 0 : i32
    return %c0_i32, %c0_i32_0 : i32, i32
  }
  func.func @transform_18(%arg0: i32) -> (i32, i32) {
    %c0_i32 = arith.constant 0 : i32
    %c0_i32_0 = arith.constant 0 : i32
    %c0_i32_1 = arith.constant 0 : i32
    return %c0_i32, %c0_i32_0 : i32, i32
  }
  func.func @transform_19(%arg0: i32) -> (i32, i32, i32) {
    %c0_i32 = arith.constant 0 : i32
    %c0_i32_0 = arith.constant 0 : i32
    %c0_i32_1 = arith.constant 0 : i32
    return %arg0, %c0_i32, %c0_i32_0 : i32, i32, i32
  }
}

</mosaic_0001>

<bundles_post_ra>
// kernel: mswa_3d_forward.1
= control target key start
LH: loop header
LB: loop body
LE: loop exit
PB: predicated region body
PF: predicated region fallthrough
CT: control target
= control target key end

     0   :  { %s4978_s0 = inlined_call_operand.vmem [shape: f32[2,16,512], index: 0, kind: input, shape index: {}]   ;;  %s4979_s1 = inlined_call_operand.vmem [shape: bf16[512,64], index: 1, kind: input, shape index: {}]   ;;  %s4980_s2 = inlined_call_operand.vmem [shape: bf16[512,73], index: 2, kind: input, shape index: {}]   ;;  %s4981_s3 = inlined_call_operand.vmem [shape: f32[16,64], index: 3, kind: input, shape index: {}]   ;;  %s4982_s4 = inlined_call_operand.vmem [shape: f32[16,73], index: 4, kind: input, shape index: {}]   ;;  %s4983_s5 = inlined_call_operand.vmem [shape: bf16[16,16], index: 5, kind: input, shape index: {}]   ;;  %s4984_s6 = inlined_call_operand.vmem [shape: f32[16,1], index: 6, kind: input, shape index: {}]   ;;  %s4985_s7 = inlined_call_operand.vmem [shape: bf16[32,16], index: 7, kind: input, shape index: {}]   ;;  %s4986_s8 = inlined_call_operand.vmem [shape: f32[32,1], index: 8, kind: input, shape index: {}]   ;;  %s4987_s9 = inlined_call_operand.vmem [shape: bf16[32,16], index: 9, kind: input, shape index: {}]   ;;  %s4988_s10 = inlined_call_operand.vmem [shape: f32[32,1], index: 10, kind: input, shape index: {}]   ;;  %s4989_s11 = inlined_call_operand.vmem [shape: bf16[16,32], index: 11, kind: input, shape index: {}]   ;;  %s4990_s12 = inlined_call_operand.vmem [shape: f32[16,1], index: 12, kind: input, shape index: {}]   ;;  %s4991_s13 = inlined_call_operand.vmem [shape: bf16[16,16], index: 13, kind: input, shape index: {}]   ;;  %s4992_s14 = inlined_call_operand.vmem [shape: f32[16,1], index: 14, kind: input, shape index: {}]   ;;  %s4993_s15 = inlined_call_operand.vmem [shape: f32[16,1], index: 15, kind: input, shape index: {}]   ;;  %s4994_s16 = inlined_call_operand.vmem [shape: f32[16,1], index: 16, kind: input, shape index: {}]   ;;  %s4995_s17 = inlined_call_operand.vmem [shape: f32[16,16], index: 17, kind: input, shape index: {}]   ;;  %s4996_s18 = inlined_call_operand.vmem [shape: bf16[64,512], index: 18, kind: input, shape index: {}]   ;;  %s4997_s19 = inlined_call_operand.vmem [shape: f32[2,16,512], index: 19, kind: output, shape index: {}]  }
   0x1   :  { %5003 = sst [smem:[#allocation3_spill]] %s4978_s0  ;;  %s4135_s0 = smov 0  }
   0x2   :  { %5004 = sst [smem:[#allocation4_spill]] %s4979_s1 }
   0x3   :  { %5005 = sst [smem:[#allocation5_spill]] %s4980_s2 }
   0x4   :  { %5006 = sst [smem:[#allocation6_spill]] %s4981_s3 }
   0x5 LB: > { %s3358_s30 = sadd.s32 4294967295, %s4030_s0   ;;  %p3362_p0 = scmp.ge.s32.totalorder %s4030_s0, 1  ;;  %s4030_s0 = sphi %s4135_s0, %s29_s0  }
   0x6   : > { %p537_p1 = scmp.lt.s32.totalorder %s4030_s0, 3 }
   0x8   : > { %p538_p2 = pnand %p3362_p0, %p537_p1 }
   0x9   : > { %s5007_s1 = sld [smem:[#allocation4_spill]] (!%p538_p2)  ;;  %p593_p3 = scmp.lt.s32.totalorder (!%p538_p2), %s3358_s30, 1  ;;  %vm4033_vm0 = vmmov (!%p538_p2), 0   ;;  %vm1319_vm1 = vcmask (!%p538_p2), 130048   ;;  %vm1489_vm2 = vcmask (!%p538_p2), 1041408   ;;  %vm1476_vm3 = vcmask (!%p538_p2), 31744  }
   0xa   : > { %541 = sbr.rel (%p538_p2) target bundleno = 3731 (0xe93), region = 96  ;;  %s5008_s2 = sld [smem:[#allocation3_spill]] (!%p538_p2)  ;;  %vm1558_vm4 = vcmask (!%p538_p2), 596992   ;;  %vm1706_vm5 = vcmask (!%p538_p2), 519168   ;;  %vm2580_vm6 = vcmask (!%p538_p2), 261120   ;;  %vm2788_vm7 = vcmask (!%p538_p2), 523264  }
   0xb   : > { %s5009_s20 = sld [smem:[#allocation5_spill]] (!%p538_p2)  ;;  %s5010_s22 = sld [smem:[#allocation6_spill]] (!%p538_p2) }
   0xf   : > { %v3789_v0 = vld [vmem:[%s5007_s1 + $0x40] sm:$0xff] (!%p538_p2)   ;;  %v3793_v4 = vld [vmem:[%s5007_s1 + $0x48] sm:$0xff] (!%p538_p2)   ;;  %v3797_v8 = vld [vmem:[%s5007_s1 + $0x50] sm:$0xff] (!%p538_p2)  }
  0x10   : > { %v3790_v1 = vld [vmem:[%s5007_s1 + $0xc0] sm:$0xff] (!%p538_p2)   ;;  %3495 = vmatprep.subr.bf16.mxu0 (!%p538_p2), %v3789_v0  ;;  %v3794_v5 = vld [vmem:[%s5007_s1 + $0xc8] sm:$0xff] (!%p538_p2)   ;;  %v3798_v9 = vld [vmem:[%s5007_s1 + $0xd0] sm:$0xff] (!%p538_p2)  }
  0x11   : > { %v3791_v2 = vld [vmem:[%s5007_s1] sm:$0xff]   ;;  %3517 = vmatprep.subr.bf16.mxu1 %v3790_v1  ;;  %v3795_v6 = vld [vmem:[%s5007_s1 + $0x8] sm:$0xff]   ;;  %v3799_v10 = vld [vmem:[%s5007_s1 + $0x10] sm:$0xff]   ;;  %s5013_s30 = smov (!%p593_p3, %s3358_s30), 1 }
  0x12   : > { %v3792_v3 = vld [vmem:[%s5007_s1 + $0x80] sm:$0xff]   ;;  %3496 = vmatpush3.bf16.msra.mxu0 %v3791_v2  ;;  %v3796_v7 = vld [vmem:[%s5007_s1 + $0x88] sm:$0xff]   ;;  %v3800_v11 = vld [vmem:[%s5007_s1 + $0x90] sm:$0xff]   ;;  %s5001_s25 = sshll.u32 %s5013_s30, 6  ;;  %s5011_s29 = sshll.u32 %s5013_s30, 6 }
  0x13   : > { %3518 = vmatpush3.bf16.msra.mxu1 %v3792_v3  ;;  %3497 = vmatprep.subr.bf16.mxu0 %v3793_v4  ;;  %v3801_v12 = vld [vmem:[%s5007_s1 + $0x58] sm:$0xff]   ;;  %v3805_v16 = vld [vmem:[%s5007_s1 + $0x60] sm:$0xff]   ;;  %v3809_v20 = vld [vmem:[%s5007_s1 + $0x68] sm:$0xff]   ;;  %s4245_s23 = scalar_lea.vmem %s5008_s2, %s5001_s25  ;;  %s4953_s24 = scalar_lea.vmem %s4997_s19, %s5011_s29 }
  0x14   : > { %3519 = vmatprep.subr.bf16.mxu1 %v3794_v5  ;;  %v3802_v13 = vld [vmem:[%s5007_s1 + $0xd8] sm:$0xff]   ;;  %v3806_v17 = vld [vmem:[%s5007_s1 + $0xe0] sm:$0xff]   ;;  %v3810_v21 = vld [vmem:[%s5007_s1 + $0xe8] sm:$0xff]  }
  0x15   : > { %v3803_v14 = vld [vmem:[%s5007_s1 + $0x18] sm:$0xff]   ;;  %v3807_v18 = vld [vmem:[%s5007_s1 + $0x20] sm:$0xff]   ;;  %v3811_v22 = vld [vmem:[%s5007_s1 + $0x28] sm:$0xff]  }
  0x16   : > { %3498 = vmatpush3.bf16.msra.mxu0 %v3795_v6  ;;  %v3804_v15 = vld [vmem:[%s5007_s1 + $0x98] sm:$0xff]   ;;  %v3808_v19 = vld [vmem:[%s5007_s1 + $0xa0] sm:$0xff]   ;;  %v3812_v23 = vld [vmem:[%s5007_s1 + $0xa8] sm:$0xff]  }
  0x17   : > { %3520 = vmatpush3.bf16.msra.mxu1 %v3796_v7  ;;  %3499 = vmatprep.subr.bf16.mxu0 %v3797_v8  ;;  %v3813_v24 = vld [vmem:[%s5007_s1 + $0x70] sm:$0xff]   ;;  %v3817_v28 = vld [vmem:[%s5007_s1 + $0x78] sm:$0xff]   ;;  %v605_v32 = vld [vmem:[%s4245_s23 + $0x8] sm:$0xff] }
  0x18   : > { %3521 = vmatprep.subr.bf16.mxu1 %v3798_v9  ;;  %v3814_v25 = vld [vmem:[%s5007_s1 + $0xf0] sm:$0xff]   ;;  %v3818_v29 = vld [vmem:[%s5007_s1 + $0xf8] sm:$0xff]   ;;  %v609_v33 = vld [vmem:[%s4245_s23 + $0x28] sm:$0xff] }
  0x19   : > { %v3815_v26 = vld [vmem:[%s5007_s1 + $0x30] sm:$0xff]   ;;  %v3819_v30 = vld [vmem:[%s5007_s1 + $0x38] sm:$0xff]   ;;  %v613_v35 = vpack.c.bf16 %v609_v33, %v605_v32  ;;  %v604_v37 = vld [vmem:[%s4245_s23] sm:$0xff] }
  0x1a   : > { %3500 = vmatpush3.bf16.msra.mxu0 %v3799_v10  ;;  %v3816_v27 = vld [vmem:[%s5007_s1 + $0xb0] sm:$0xff]   ;;  %v3820_v31 = vld [vmem:[%s5007_s1 + $0xb8] sm:$0xff]   ;;  %v608_v38 = vld [vmem:[%s4245_s23 + $0x20] sm:$0xff] }
  0x1b   : > { %3522 = vmatpush3.bf16.msra.mxu1 %v3800_v11  ;;  %3501 = vmatprep.subr.bf16.mxu0 %v3801_v12  ;;  %v607_v34 = vld [vmem:[%s4245_s23 + $0x18] sm:$0xff]  ;;  %v4259_v40 = vpack.c.bf16 %v608_v38, %v604_v37  ;;  %v606_v41 = vld [vmem:[%s4245_s23 + $0x10] sm:$0xff]  ;;  %v3821_v44 = vld [vmem:[%s5009_s20 + $0x40] sm:$0xff]   ;;  %v4032_v12 = vmov 0.0  }
  0x1c   : > { %3523 = vmatprep.subr.bf16.mxu1 %v3802_v13  ;;  %v611_v36 = vld [vmem:[%s4245_s23 + $0x38] sm:$0xff]  ;;  %v610_v42 = vld [vmem:[%s4245_s23 + $0x30] sm:$0xff]  ;;  %904 = vmatprep.mubr.bf16.mxu0 %v613_v35  ;;  %v3822_v45 = vld [vmem:[%s5009_s20] sm:$0xff]  }
  0x1d   : > { %v615_v39 = vpack.c.bf16 %v611_v36, %v607_v34  ;;  %v4263_v43 = vpack.c.bf16 %v610_v42, %v606_v41  ;;  %v3823_v46 = vld [vmem:[%s5009_s20 + $0xc0] sm:$0xff]   ;;  %v3825_v48 = vld [vmem:[%s5009_s20 + $0x48] sm:$0xff]   ;;  %v3829_v52 = vld [vmem:[%s5009_s20 + $0x50] sm:$0xff]  }
  0x1e   : > { %3502 = vmatpush3.bf16.msra.mxu0 %v3803_v14  ;;  %v3824_v47 = vld [vmem:[%s5009_s20 + $0x80] sm:$0xff]   ;;  %v3826_v49 = vld [vmem:[%s5009_s20 + $0x8] sm:$0xff]   ;;  %v3830_v53 = vld [vmem:[%s5009_s20 + $0x10] sm:$0xff]  }
  0x1f   : > { %3524 = vmatpush3.bf16.msra.mxu1 %v3804_v15  ;;  %3503 = vmatprep.subr.bf16.mxu0 %v3805_v16  ;;  %v3827_v50 = vld [vmem:[%s5009_s20 + $0xc8] sm:$0xff]   ;;  %v3831_v54 = vld [vmem:[%s5009_s20 + $0xd0] sm:$0xff]   ;;  %v3833_v56 = vld [vmem:[%s5009_s20 + $0x58] sm:$0xff]   ;;  %v4034_v15 = vmov 0  }
  0x20   : > { %3525 = vmatprep.subr.bf16.mxu1 %v3806_v17  ;;  %945 = vmatprep.mubr.bf16.mxu1 %v615_v39  ;;  %v3828_v51 = vld [vmem:[%s5009_s20 + $0x88] sm:$0xff]   ;;  %v3832_v55 = vld [vmem:[%s5009_s20 + $0x90] sm:$0xff]   ;;  %v3834_v57 = vld [vmem:[%s5009_s20 + $0x18] sm:$0xff]  }
  0x21   : > { %v3835_v58 = vld [vmem:[%s5009_s20 + $0xd8] sm:$0xff]   ;;  %v3837_v60 = vld [vmem:[%s5009_s20 + $0x60] sm:$0xff]   ;;  %v3841_v0 = vld [vmem:[%s5009_s20 + $0x68] sm:$0xff]   ;;  %3787 = vset.pattern.permute.xlu0 %v4034_v15 }
  0x22   : > { %3504 = vmatpush3.bf16.msra.mxu0 %v3807_v18  ;;  %v3836_v59 = vld [vmem:[%s5009_s20 + $0x98] sm:$0xff]   ;;  %v3838_v61 = vld [vmem:[%s5009_s20 + $0x20] sm:$0xff]   ;;  %v3842_v1 = vld [vmem:[%s5009_s20 + $0x28] sm:$0xff]  }
  0x23   : > { %3526 = vmatpush3.bf16.msra.mxu1 %v3808_v19  ;;  %3505 = vmatprep.subr.bf16.mxu0 %v3809_v20  ;;  %v3839_v62 = vld [vmem:[%s5009_s20 + $0xe0] sm:$0xff]   ;;  %v3843_v2 = vld [vmem:[%s5009_s20 + $0xe8] sm:$0xff]   ;;  %v3845_v4 = vld [vmem:[%s5009_s20 + $0x70] sm:$0xff]  }
  0x24   : > { %3527 = vmatprep.subr.bf16.mxu1 %v3810_v21  ;;  %v3840_v63 = vld [vmem:[%s5009_s20 + $0xa0] sm:$0xff]   ;;  %v3844_v3 = vld [vmem:[%s5009_s20 + $0xa8] sm:$0xff]   ;;  %v3846_v5 = vld [vmem:[%s5009_s20 + $0x30] sm:$0xff]  }
  0x25   : > { %v3847_v6 = vld [vmem:[%s5009_s20 + $0xf0] sm:$0xff]   ;;  %v3849_v8 = vld [vmem:[%s5009_s20 + $0x78] sm:$0xff]   ;;  %v3854_v13 = vld [vmem:[%s4985_s7] sm:$0xff]  }
  0x26   : > { %3506 = vmatpush3.bf16.msra.mxu0 %v3811_v22  ;;  %v3848_v7 = vld [vmem:[%s5009_s20 + $0xb0] sm:$0xff]   ;;  %v3850_v9 = vld [vmem:[%s5009_s20 + $0x38] sm:$0xff]   ;;  %v1302_v14 = vld [vmem:[%s4984_s6] sm:$0xff] }
  0x27   : > { %3528 = vmatpush3.bf16.msra.mxu1 %v3812_v23  ;;  %3507 = vmatprep.subr.bf16.mxu0 %v3813_v24  ;;  %v3851_v10 = vld [vmem:[%s5009_s20 + $0xf8] sm:$0xff]   ;;  %v1368_v16 = vld [vmem:[%s4986_s8] sm:$0xff] }
  0x28   : > { %3529 = vmatprep.subr.bf16.mxu1 %v3814_v25  ;;  %v3852_v11 = vld [vmem:[%s5009_s20 + $0xb8] sm:$0xff]   ;;  %1306 = vperm.xlu0 %3787, %v1302_v14   ;;  %v3853_v36 = vld [vmem:[%s4983_s5] sm:$0xff]  }
  0x29   : > { %v1023_v38 = vld [vmem:[%s4982_s4] sm:$0xff] }
  0x2a   : > { %3508 = vmatpush3.bf16.msra.mxu0 %v3815_v26 }
  0x2b   : > { %3530 = vmatpush3.bf16.msra.mxu1 %v3816_v27  ;;  %3509 = vmatprep.subr.bf16.mxu0 %v3817_v28 }
  0x2c   : > { %3531 = vmatprep.subr.bf16.mxu1 %v3818_v29  ;;  %1374 = vperm.xlu0 %3787, %v1368_v16  }
  0x2e   : > { %3510 = vmatpush3.bf16.msra.mxu0 %v3819_v30  ;;  %v1018_v30 = vld [vmem:[%s5010_s22] sm:$0xff] }
  0x2f   : > { %3532 = vmatpush3.bf16.msra.mxu1 %v3820_v31  ;;  %3539 = vmatprep.subr.bf16.mxu0 %v3821_v44  ;;  %v1019_v31 = vld [vmem:[%s5010_s22 + $0x8] sm:$0xff] }
  0x30   : > { %3561 = vmatprep.subr.bf16.mxu1 %v3823_v46 }
  0x31   : > { %905 = vmatmul.mubr.bf16.vlgmr.msra.gmra.mrb[0].mxu0 %v4259_v40 }
  0x32   : > { %946 = vmatmul.mubr.bf16.vlgmr.msra.gmra.mrb[0].mxu1 %v4263_v43  ;;  %3540 = vmatpush3.bf16.msra.mxu0 %v3822_v45 }
  0x33   : > { %1249 = vmatprep.mubr.bf16.mxu0 %v613_v35  ;;  %1290 = vmatprep.mubr.bf16.mxu1 %v615_v39 }
  0x34   : > { %3562 = vmatpush3.bf16.msra.mxu1 %v3824_v47  ;;  %3541 = vmatprep.subr.bf16.mxu0 %v3825_v48 }
  0x35   : > { %3563 = vmatprep.subr.bf16.mxu1 %v3827_v50 }
  0x36   : > { %3542 = vmatpush3.bf16.msra.mxu0 %v3826_v49 }
  0x37   : > { %3543 = vmatprep.subr.bf16.mxu0 %v3829_v52 }
  0x38   : > { %3564 = vmatpush3.bf16.msra.mxu1 %v3828_v51 }
  0x39   : > { %3565 = vmatprep.subr.bf16.mxu1 %v3831_v54 }
  0x3a   : > { %3544 = vmatpush3.bf16.msra.mxu0 %v3830_v53 }
  0x3b   : > { %3545 = vmatprep.subr.bf16.mxu0 %v3833_v56  ;;  %v3855_v56 = vld [vmem:[%s4985_s7 + $0x8] sm:$0xff]  }
  0x3c   : > { %3566 = vmatpush3.bf16.msra.mxu1 %v3832_v55 }
  0x3d   : > { %3567 = vmatprep.subr.bf16.mxu1 %v3835_v58 }
  0x3e   : > { %3546 = vmatpush3.bf16.msra.mxu0 %v3834_v57 }
  0x3f   : > { %3547 = vmatprep.subr.bf16.mxu0 %v3837_v60 }
  0x40   : > { %3568 = vmatpush3.bf16.msra.mxu1 %v3836_v59 }
  0x41   : > { %3569 = vmatprep.subr.bf16.mxu1 %v3839_v62 }
  0x42   : > { %3548 = vmatpush3.bf16.msra.mxu0 %v3838_v61 }
  0x43   : > { %3549 = vmatprep.subr.bf16.mxu0 %v3841_v0 }
  0x44   : > { %3570 = vmatpush3.bf16.msra.mxu1 %v3840_v63 }
  0x45   : > { %3571 = vmatprep.subr.bf16.mxu1 %v3843_v2 }
  0x46   : > { %3550 = vmatpush3.bf16.msra.mxu0 %v3842_v1 }
  0x47   : > { %3551 = vmatprep.subr.bf16.mxu0 %v3845_v4 }
  0x48   : > { %3572 = vmatpush3.bf16.msra.mxu1 %v3844_v3 }
  0x49   : > { %3573 = vmatprep.subr.bf16.mxu1 %v3847_v6 }
  0x4a   : > { %3552 = vmatpush3.bf16.msra.mxu0 %v3846_v5 }
  0x4b   : > { %3553 = vmatprep.subr.bf16.mxu0 %v3849_v8 }
  0x4c   : > { %3574 = vmatpush3.bf16.msra.mxu1 %v3848_v7 }
  0x4d   : > { %3575 = vmatprep.subr.bf16.mxu1 %v3851_v10 }
  0x4e   : > { %3554 = vmatpush3.bf16.msra.mxu0 %v3850_v9 }
  0x4f   : > { %3636 = vmatprep.subr.bf16.mxu0 %v4032_v12 }
  0x50   : > { %3576 = vmatpush3.bf16.msra.mxu1 %v3852_v11 }
  0x51   : > { %1250 = vmatmul.mubr.bf16.vlgmr.msra.gmra.mrb[4].mxu0 %v4259_v40 }
  0x52   : > { %3638 = vmatprep.mubr.msk.bf16.mxu0 %vm4033_vm0, %v4032_v12 }
  0x53   : > { %1291 = vmatmul.mubr.bf16.vlgmr.msra.gmra.mrb[4].mxu1 %v4263_v43  ;;  %v1024_v43 = vld [vmem:[%s4982_s4 + $0x8] sm:$0xff] }
  0x54   : > { %3644 = vmatprep.mubr.msk.bf16.mxu1 %vm1319_vm1, %v3854_v13 }
  0xa7   : > { %v1307_v57 = vpop.permute.xlu0 %1306 }
  0xab   : > { %v1375_v2 = vpop.permute.xlu0 %1374 }
 0x104   : > { %v3511_v17 = vpop.f32.mrb[0].mxu0 }
 0x105   : > { %v3533_v18 = vpop.f32.mrb[0].mxu1  ;;  %v3512_v19 = vpop.f32.mrb[1].mxu0 }
 0x106   : > { %v3513_v20 = vadd.f32 %v3512_v19, %v3511_v17  ;;  %v3534_v21 = vpop.f32.mrb[1].mxu1  ;;  %v3514_v22 = vpop.f32.mrb[2].mxu0 }
 0x107   : > { %v3535_v23 = vadd.f32 %v3534_v21, %v3533_v18  ;;  %v3536_v24 = vpop.f32.mrb[2].mxu1  ;;  %v3515_v25 = vpop.f32.mrb[3].mxu0 }
 0x108   : > { %v3516_v26 = vadd.f32 %v3515_v25, %v3514_v22  ;;  %v3537_v27 = vpop.f32.mrb[3].mxu1 }
 0x109   : > { %v4379_v28 = vadd.f32 %v3535_v23, %v3513_v20  ;;  %v3538_v29 = vadd.f32 %v3537_v27, %v3536_v24 }
 0x10b   : > { %v4387_v32 = vadd.f32 %v3538_v29, %v3516_v26  ;;  %v1020_v33 = vadd.f32 %v1018_v30, %v4379_v28 }
 0x10d   : > { %v1021_v34 = vadd.f32 %v1019_v31, %v4387_v32 }
 0x10f   : > { %v1022_v35 = vpack.c.bf16 %v1021_v34, %v1020_v33 }
 0x111   : > { %3637 = vmatpush3.bf16.msra.mxu0 %v1022_v35 }
 0x114   : > { %3639 = vmatmul.mubr.msk.bf16.vlgmr.msra.gmra.mrb[8].mxu0 %vm1319_vm1, %v3853_v36 }
 0x124   : > { %v3555_v37 = vpop.f32.mrb[4].mxu0 }
 0x125   : > { %v3556_v39 = vpop.f32.mrb[5].mxu0 }
 0x126   : > { %v3557_v40 = vadd.f32 %v3556_v39, %v3555_v37  ;;  %v3558_v41 = vpop.f32.mrb[6].mxu0  ;;  %v3577_v42 = vpop.f32.mrb[4].mxu1 }
 0x127   : > { %v3559_v44 = vpop.f32.mrb[7].mxu0  ;;  %v3578_v45 = vpop.f32.mrb[5].mxu1 }
 0x128   : > { %v1252_v46 = vadd.f32 %v3557_v40, %v1023_v38  ;;  %v3560_v47 = vadd.f32 %v3559_v44, %v3558_v41  ;;  %v3579_v48 = vadd.f32 %v3578_v45, %v3577_v42  ;;  %v3580_v49 = vpop.f32.mrb[6].mxu1 }
 0x129   : > { %v3581_v50 = vpop.f32.mrb[7].mxu1 }
 0x12a   : > { %v1255_v51 = vadd.f32 %v3560_v47, %v1024_v43  ;;  %v1293_v52 = vadd.f32 %v3579_v48, %v1252_v46  ;;  %v3582_v53 = vadd.f32 %v3581_v50, %v3580_v49 }
 0x12c   : > { %v1296_v54 = vadd.f32 %v3582_v53, %v1255_v51 }
 0x12e   : > { %v1299_v55 = vpack.c.bf16 %v1296_v54, %v1293_v52 }
 0x130   : > { %3642 = vmatprep.subr.bf16.mxu1 %v1299_v55 }
 0x131   : > { %3643 = vmatpush3.bf16.msra.mxu1 %v1299_v55 }
 0x132   : > { %3658 = vmatprep.subr.bf16.mxu1 %v4032_v12 }
 0x134   : > { %3645 = vmatmul.mubr.msk.bf16.vlgmr.msra.gmra.mrb[8].mxu1 %vm1319_vm1, %v3855_v56 }
 0x135   : > { %3666 = vmatprep.mubr.msk.bf16.mxu1 %vm4033_vm0, %v4032_v12 }
 0x1e7   : > { %v1357_v58 = vpop.f32.mrb[8].mxu0 }
 0x1e8   : > { %v1358_v59 = vadd.f32 %v1357_v58, %v1307_v57  ;;  %v3640_v60 = vpop.f32.mrb[9].mxu0 }
 0x1e9   : > { %v4408_v61 = vpop.f32.mrb[10].mxu0 }
 0x1ea   : > { %v1457_v62 = vpack.c.bf16 %v1358_v59, %v1358_v59  ;;  %v3641_v63 = vpop.f32.mrb[11].mxu0 }
 0x1ec   : > { %1460 = vxpose.xlu1.c.b16.start.end [1/1] (short) (narrow) %v1457_v62, 64  ;;  %v1709_v0 = vrot.slane %v1457_v62, 2 }
 0x1f9   : > { %1711 = vxpose.xlu1.c.b16.start.end [1/1] (short) (narrow) %v1709_v0, 64 }
 0x1fd   : > { %3788 = vset.pattern.permute.xlu1 %v4034_v15 }
 0x207   : > { %v4411_v1 = vpop.f32.mrb[8].mxu1 }
 0x208   : > { %v1442_v3 = vpop.f32.mrb[9].mxu1 }
 0x209   : > { %v1443_v4 = vadd.f32 %v1442_v3, %v1375_v2  ;;  %v4413_v5 = vpop.f32.mrb[10].mxu1 }
 0x20a   : > { %v4415_v6 = vpop.f32.mrb[11].mxu1 }
 0x20b   : > { %v1458_v7 = vpack.c.bf16 %v1443_v4, %v1443_v4 }
 0x20d   : > { %v1728_v8 = vrot.slane %v1458_v7, 2  ;;  %3772 = vmatprep.subr.msk.bf16.mxu0 %vm1489_vm2, %v1458_v7  ;;  %v1491_v9 = vsel %vm1489_vm2, %v1458_v7, 0 }
 0x20e   : > { %3649 = vmatpush3.bf16.msra.mxu0 %v1491_v9 }
 0x20f   : > { %3773 = vmatprep.subr.msk.bf16.mxu0 %vm1489_vm2, %v1728_v8  ;;  %v1742_v13 = vsel %vm1489_vm2, %v1728_v8, 0 }
 0x252   : > { %v1468_v10 = vpop.trf.xlu1 }
 0x253   : > { %3650 = vmatprep.mubr.msk.bf16.mxu0 %vm1476_vm3, %v1468_v10 }
 0x256   : > { %v1469_v11 = vpop.trf.xlu1 }
 0x257   : > { %3651 = vmatmul.mubr.msk.bf16.vlgmr.msra.gmra.mrb[12].mxu0 %vm1476_vm3, %v1469_v11 }
 0x258   : > { %3671 = vmatpush3.bf16.msra.mxu0 %v1742_v13 }
 0x259   : > { %3680 = vmatprep.subr.bf16.mxu0 %v4032_v12 }
 0x25a   : > { %v1470_v14 = vpop.trf.xlu1 }
 0x25b   : > { %3654 = vmatprep.mubr.msk.bf16.mxu0 %vm1476_vm3, %v1470_v14 }
 0x25e   : > { %v1471_v16 = vpop.trf.xlu1 }
 0x25f   : > { %3655 = vmatmul.mubr.msk.bf16.gmra.mrb[16].mxu0 %vm1476_vm3, %v1471_v16 }
 0x262   : > { %v1719_v17 = vpop.trf.xlu1 }
 0x263   : > { %3672 = vmatprep.mubr.msk.bf16.mxu0 %vm1476_vm3, %v1719_v17 }
 0x266   : > { %v1720_v18 = vpop.trf.xlu1 }
 0x267   : > { %3673 = vmatmul.mubr.msk.bf16.vlgmr.msra.gmra.mrb[20].mxu0 %vm1476_vm3, %v1720_v18 }
 0x26a   : > { %v1721_v19 = vpop.trf.xlu1 }
 0x26b   : > { %3676 = vmatprep.mubr.msk.bf16.mxu0 %vm1476_vm3, %v1721_v19 }
 0x26e   : > { %v1722_v20 = vpop.trf.xlu1 }
 0x26f   : > { %3677 = vmatmul.mubr.msk.bf16.gmra.mrb[24].mxu0 %vm1476_vm3, %v1722_v20 }
 0x270   : > { %3688 = vmatprep.mubr.msk.bf16.mxu0 %vm4033_vm0, %v4032_v12 }
 0x32a   : > { %v4432_v21 = vpop.f32.mrb[12].mxu0 }
 0x32b   : > { %v4434_v22 = vpop.f32.mrb[13].mxu0  ;;  %v1565_v41 = vsel %vm1558_vm4, %v4432_v21, -inf }
 0x32c   : > { %v3653_v23 = vpop.f32.mrb[14].mxu0  ;;  %v1559_v24 = vsel %vm1558_vm4, %v4434_v22, -inf }
 0x32d   : > { %1560 = vmax.xlane.f32.xlu0 %v1559_v24  ;;  %v1530_v25 = vpop.f32.mrb[15].mxu0  ;;  %v1568_v29 = vsel %vm1558_vm4, %v3653_v23, -inf }
 0x32e   : > { %v1562_v26 = vsel %vm1558_vm4, %v1530_v25, -inf }
 0x32f   : > { %1563 = vmax.xlane.f32.xlu1 %v1562_v26 }
 0x332   : > { %v4439_v27 = vpop.f32.mrb[16].mxu0 }
 0x333   : > { %1569 = vmax.xlane.f32.xlu1 %v1568_v29  ;;  %v4442_v30 = vpop.f32.mrb[17].mxu0  ;;  %v1577_v53 = vsel %vm1558_vm4, %v4439_v27, -inf }
 0x334   : > { %v4444_v31 = vpop.f32.mrb[18].mxu0  ;;  %v1571_v50 = vsel %vm1558_vm4, %v4442_v30, -inf }
 0x335   : > { %v4446_v33 = vpop.f32.mrb[19].mxu0  ;;  %v1580_v47 = vsel %vm1558_vm4, %v4444_v31, -inf }
 0x336   : > { %v1574_v34 = vsel %vm1558_vm4, %v4446_v33, -inf }
 0x337   : > { %1575 = vmax.xlane.f32.xlu1 %v1574_v34 }
 0x33a   : > { %v3674_v35 = vpop.f32.mrb[20].mxu0 }
 0x33b   : > { %v4450_v36 = vpop.f32.mrb[21].mxu0  ;;  %v1815_v45 = vsel %vm1558_vm4, %v3674_v35, -inf }
 0x33c   : > { %v4452_v37 = vpop.f32.mrb[22].mxu0  ;;  %v1809_v38 = vsel %vm1558_vm4, %v4450_v36, -inf }
 0x33d   : > { %1810 = vmax.xlane.f32.xlu0 %v1809_v38  ;;  %v4456_v39 = vpop.f32.mrb[23].mxu0  ;;  %v1818_v40 = vsel %vm1558_vm4, %v4452_v37, -inf }
 0x33e   : > { %1819 = vmax.xlane.f32.xlu1 %v1818_v40  ;;  %v1812_v42 = vsel %vm1558_vm4, %v4456_v39, -inf }
 0x341   : > { %1566 = vmax.xlane.f32.xlu0 %v1565_v41 }
 0x342   : > { %1813 = vmax.xlane.f32.xlu1 %v1812_v42  ;;  %v4464_v43 = vpop.f32.mrb[24].mxu0 }
 0x343   : > { %v4466_v44 = vpop.f32.mrb[25].mxu0  ;;  %v1827_v54 = vsel %vm1558_vm4, %v4464_v43, -inf }
 0x344   : > { %v4469_v46 = vpop.f32.mrb[26].mxu0  ;;  %v1821_v51 = vsel %vm1558_vm4, %v4466_v44, -inf }
 0x345   : > { %1816 = vmax.xlane.f32.xlu0 %v1815_v45  ;;  %v4473_v48 = vpop.f32.mrb[27].mxu0  ;;  %v1830_v49 = vsel %vm1558_vm4, %v4469_v46, -inf }
 0x346   : > { %1581 = vmax.xlane.f32.xlu1 %v1580_v47  ;;  %v1824_v52 = vsel %vm1558_vm4, %v4473_v48, -inf }
 0x349   : > { %1572 = vmax.xlane.f32.xlu0 %v1571_v50 }
 0x34a   : > { %1831 = vmax.xlane.f32.xlu1 %v1830_v49 }
 0x34d   : > { %1822 = vmax.xlane.f32.xlu0 %v1821_v51 }
 0x34e   : > { %1825 = vmax.xlane.f32.xlu1 %v1824_v52 }
 0x351   : > { %1578 = vmax.xlane.f32.xlu0 %v1577_v53  ;;  %v1370_v53 = vld [vmem:[%s4986_s8 + $0x10] sm:$0xff] }
 0x355   : > { %1828 = vmax.xlane.f32.xlu0 %v1827_v54  ;;  %v1303_v54 = vld [vmem:[%s4984_s6 + $0x8] sm:$0xff] }
 0x3ba   : > { %v1561_v62 = vpop.xlane.xlu0 %1560 }
 0x3bb   : > { %v1583_v0 = vsub.f32 %v4434_v22, %v1561_v62 }
 0x3bc   : > { %v1564_v55 = vpop.xlane.xlu1 %1563 }
 0x3bd   : > { %v1584_v56 = vsub.f32 %v1530_v25, %v1564_v55  ;;  %v1591_v9 = vmul.f32 1.442695, %v1583_v0 }
 0x3bf   : > { %v1593_v59 = vmul.f32 1.442695, %v1584_v56 }
 0x3c0   : > { %v1570_v57 = vpop.xlane.xlu1 %1569 }
 0x3c1   : > { %v1586_v58 = vsub.f32 %v3653_v23, %v1570_v57 }
 0x3c3   : > { %v1597_v60 = vmul.f32 1.442695, %v1586_v58 }
 0x3c4   : > { %v1576_v10 = vpop.xlane.xlu1 %1575 }
 0x3c5   : > { %3884 = vpow2.f32 %v1597_v60  ;;  %v1588_v16 = vsub.f32 %v4446_v33, %v1576_v10 }
 0x3c6   : > { %3886 = vpow2.f32 %v1593_v59 }
 0x3c7   : > { %v1601_v22 = vmul.f32 1.442695, %v1588_v16 }
 0x3ca   : > { %v1811_v63 = vpop.xlane.xlu0 %1810 }
 0x3cb   : > { %v1833_v18 = vsub.f32 %v4450_v36, %v1811_v63  ;;  %v1820_v52 = vpop.xlane.xlu1 %1819 }
 0x3cc   : > { %v1836_v58 = vsub.f32 %v4452_v37, %v1820_v52 }
 0x3cd   : > { %v1841_v23 = vmul.f32 1.442695, %v1833_v18 }
 0x3ce   : > { %v1567_v2 = vpop.xlane.xlu0 %1566  ;;  %v1847_v60 = vmul.f32 1.442695, %v1836_v58 }
 0x3cf   : > { %v4488_v3 = vpop.eup %3884  ;;  %v1585_v4 = vsub.f32 %v4432_v21, %v1567_v2  ;;  %v1814_v55 = vpop.xlane.xlu1 %1813 }
 0x3d0   : > { %v1616_v7 = vsel %vm1558_vm4, %v4488_v3, 0.0  ;;  %v4493_v8 = vpop.eup %3886  ;;  %v1834_v62 = vsub.f32 %v4456_v39, %v1814_v55 }
 0x3d1   : > { %v1595_v11 = vmul.f32 1.442695, %v1585_v4  ;;  %1617 = vadd.xlane.f32.xlu1 %v1616_v7  ;;  %v1610_v17 = vsel %vm1558_vm4, %v4493_v8, 0.0 }
 0x3d2   : > { %v1817_v13 = vpop.xlane.xlu0 %1816  ;;  %v1843_v0 = vmul.f32 1.442695, %v1834_v62 }
 0x3d3   : > { %3888 = vpow2.f32 %v1595_v11  ;;  %v1835_v14 = vsub.f32 %v3674_v35, %v1817_v13  ;;  %v1582_v56 = vpop.xlane.xlu1 %1581 }
 0x3d4   : > { %3890 = vpow2.f32 %v1591_v9  ;;  %v1590_v57 = vsub.f32 %v4444_v31, %v1582_v56 }
 0x3d5   : > { %v1845_v19 = vmul.f32 1.442695, %v1835_v14  ;;  %1611 = vadd.xlane.f32.xlu1 %v1610_v17 }
 0x3d6   : > { %v1573_v20 = vpop.xlane.xlu0 %1572  ;;  %v1605_v59 = vmul.f32 1.442695, %v1590_v57 }
 0x3d7   : > { %v1587_v21 = vsub.f32 %v4442_v30, %v1573_v20  ;;  %3892 = vpow2.f32 %v1845_v19  ;;  %v1832_v4 = vpop.xlane.xlu1 %1831 }
 0x3d8   : > { %v1840_v10 = vsub.f32 %v4469_v46, %v1832_v4 }
 0x3d9   : > { %v1599_v24 = vmul.f32 1.442695, %v1587_v21 }
 0x3da   : > { %v1823_v25 = vpop.xlane.xlu0 %1822  ;;  %v1855_v13 = vmul.f32 1.442695, %v1840_v10 }
 0x3db   : > { %3894 = vpow2.f32 %v1599_v24  ;;  %v1837_v26 = vsub.f32 %v4466_v44, %v1823_v25  ;;  %v1826_v37 = vpop.xlane.xlu1 %1825  ;;  %v1369_v25 = vld [vmem:[%s4986_s8 + $0x8] sm:$0xff] }
 0x3dc   : > { %3896 = vpow2.f32 %v1601_v22 }
 0x3dd   : > { %v4501_v29 = vpop.eup %3888  ;;  %3898 = vpow2.f32 %v1841_v23  ;;  %v1849_v31 = vmul.f32 1.442695, %v1837_v26 }
 0x3de   : > { %v1579_v33 = vpop.xlane.xlu0 %1578  ;;  %v1613_v34 = vsel %vm1558_vm4, %v4501_v29, 0.0  ;;  %v4505_v35 = vpop.eup %3890 }
 0x3df   : > { %v1589_v30 = vsub.f32 %v4439_v27, %v1579_v33  ;;  %1614 = vadd.xlane.f32.xlu0 %v1613_v34  ;;  %v1607_v38 = vsel %vm1558_vm4, %v4505_v35, 0.0 }
 0x3e1   : > { %v1603_v36 = vmul.f32 1.442695, %v1589_v30  ;;  %v4510_v40 = vpop.eup %3892 }
 0x3e2   : > { %v1863_v44 = vsel %vm1558_vm4, %v4510_v40, 0.0  ;;  %v1829_v63 = vpop.xlane.xlu0 %1828 }
 0x3e3   : > { %3900 = vpow2.f32 %v1603_v36  ;;  %1608 = vadd.xlane.f32.xlu0 %v1607_v38  ;;  %v1839_v2 = vsub.f32 %v4464_v43, %v1829_v63  ;;  %v1838_v43 = vsub.f32 %v4473_v48, %v1826_v37 }
 0x3e4   : > { %3902 = vpow2.f32 %v1605_v59 }
 0x3e5   : > { %v4512_v41 = vpop.eup %3894  ;;  %3904 = vpow2.f32 %v1847_v60  ;;  %v1853_v7 = vmul.f32 1.442695, %v1839_v2  ;;  %v1851_v46 = vmul.f32 1.442695, %v1838_v43 }
 0x3e6   : > { %v4514_v42 = vpop.eup %3896  ;;  %v1619_v45 = vsel %vm1558_vm4, %v4512_v41, 0.0  ;;  %3906 = vpow2.f32 %v1843_v0 }
 0x3e7   : > { %v4520_v27 = vpop.eup %3898  ;;  %1864 = vadd.xlane.f32.xlu0 %v1863_v44  ;;  %1620 = vadd.xlane.f32.xlu1 %v1619_v45  ;;  %v1622_v49 = vsel %vm1558_vm4, %v4514_v42, 0.0  ;;  %3908 = vpow2.f32 %v1853_v7 }
 0x3e8   : > { %v1857_v47 = vsel %vm1558_vm4, %v4520_v27, 0.0  ;;  %3910 = vpow2.f32 %v1849_v31 }
 0x3e9   : > { %3912 = vpow2.f32 %v1855_v13 }
 0x3ea   : > { %3914 = vpow2.f32 %v1851_v46 }
 0x3eb   : > { %1858 = vadd.xlane.f32.xlu0 %v1857_v47  ;;  %1623 = vadd.xlane.f32.xlu1 %v1622_v49 }
 0x3ed   : > { %v4526_v50 = vpop.eup %3900 }
 0x3ee   : > { %v1625_v51 = vsel %vm1558_vm4, %v4526_v50, 0.0  ;;  %v4540_v9 = vpop.eup %3902 }
 0x3ef   : > { %1626 = vadd.xlane.f32.xlu1 %v1625_v51  ;;  %v1628_v11 = vsel %vm1558_vm4, %v4540_v9, 0.0  ;;  %v4545_v39 = vpop.eup %3904 }
 0x3f0   : > { %v1866_v14 = vsel %vm1558_vm4, %v4545_v39, 0.0  ;;  %v4550_v16 = vpop.eup %3906 }
 0x3f1   : > { %v1860_v17 = vsel %vm1558_vm4, %v4550_v16, 0.0  ;;  %v4554_v18 = vpop.eup %3908 }
 0x3f2   : > { %v1875_v19 = vsel %vm1558_vm4, %v4554_v18, 0.0  ;;  %v4558_v20 = vpop.eup %3910 }
 0x3f3   : > { %v1869_v48 = vsel %vm1558_vm4, %v4558_v20, 0.0  ;;  %v4562_v21 = vpop.eup %3912 }
 0x3f4   : > { %v1878_v22 = vsel %vm1558_vm4, %v4562_v21, 0.0  ;;  %v4566_v23 = vpop.eup %3914 }
 0x3f5   : > { %v1872_v24 = vsel %vm1558_vm4, %v4566_v23, 0.0 }
 0x400   : > { %1384 = vperm.xlu1 %3788, %v1370_v53  }
 0x401   : > { %1311 = vperm.xlu0 %3787, %v1303_v54  }
 0x420   : > { %1629 = vadd.xlane.f32.xlu0 %v1628_v11 }
 0x424   : > { %1867 = vadd.xlane.f32.xlu1 %v1866_v14 }
 0x428   : > { %1861 = vadd.xlane.f32.xlu1 %v1860_v17 }
 0x42c   : > { %1876 = vadd.xlane.f32.xlu1 %v1875_v19 }
 0x430   : > { %1870 = vadd.xlane.f32.xlu1 %v1869_v48 }
 0x434   : > { %1879 = vadd.xlane.f32.xlu1 %v1878_v22 }
 0x438   : > { %1873 = vadd.xlane.f32.xlu1 %v1872_v24 }
 0x449   : > { %1379 = vperm.xlu1 %3788, %v1369_v25  }
 0x45e   : > { %v1618_v26 = vpop.xlane.xlu1 %1617 }
 0x462   : > { %v1612_v33 = vpop.xlane.xlu1 %1611 }
 0x463   : > { %3916 = vrcp.f32 %v1612_v33 }
 0x46c   : > { %v1615_v34 = vpop.xlane.xlu0 %1614 }
 0x46d   : > { %v3917_v45 = vpop.eup %3916 }
 0x46e   : > { %v1640_v52 = vmul.f32 %v3917_v45, %v4493_v8 }
 0x470   : > { %v1609_v30 = vpop.xlane.xlu0 %1608 }
 0x471   : > { %3918 = vrcp.f32 %v1609_v30 }
 0x472   : > { %3920 = vrcp.f32 %v1615_v34 }
 0x473   : > { %3922 = vrcp.f32 %v1618_v26 }
 0x474   : > { %v1621_v36 = vpop.xlane.xlu1 %1620  ;;  %v1865_v38 = vpop.xlane.xlu0 %1864 }
 0x478   : > { %v1624_v44 = vpop.xlane.xlu1 %1623  ;;  %v1859_v49 = vpop.xlane.xlu0 %1858 }
 0x479   : > { %3924 = vrcp.f32 %v1624_v44 }
 0x47a   : > { %3926 = vrcp.f32 %v1621_v36 }
 0x47b   : > { %v3919_v47 = vpop.eup %3918 }
 0x47c   : > { %v1639_v51 = vmul.f32 %v3919_v47, %v4505_v35  ;;  %v3921_v53 = vpop.eup %3920 }
 0x47d   : > { %v3923_v55 = vpop.eup %3922  ;;  %v1641_v58 = vmul.f32 %v3921_v53, %v4501_v29 }
 0x47e   : > { %v1647_v54 = vpack.c.bf16 %v1640_v52, %v1639_v51  ;;  %v1642_v60 = vmul.f32 %v3923_v55, %v4488_v3  ;;  %v1627_v3 = vpop.xlane.xlu1 %1626 }
 0x47f   : > { %3928 = vrcp.f32 %v1627_v3 }
 0x480   : > { %v1312_v56 = vpop.permute.xlu0 %1311  ;;  %v1655_v57 = vsel %vm1558_vm4, %v1647_v54, 0  ;;  %v1648_v35 = vpack.c.bf16 %v1642_v60, %v1641_v58 }
 0x481   : > { %v1361_v59 = vadd.f32 %v4408_v61, %v1312_v56  ;;  %3659 = vmatpush3.bf16.xpose.msra.mxu1 %v1655_v57 }
 0x482   : > { %3660 = vmatprep.subr.bf16.mxu1 %v4032_v12  ;;  %v1658_v2 = vsel %vm1558_vm4, %v1648_v35, 0  ;;  %v1385_v10 = vpop.permute.xlu1 %1384 }
 0x483   : > { %v1959_v62 = vpack.c.bf16 %v1361_v59, %v1361_v59  ;;  %v3925_v63 = vpop.eup %3924  ;;  %v1451_v22 = vadd.f32 %v4411_v1, %v1385_v10 }
 0x484   : > { %v3927_v0 = vpop.eup %3926  ;;  %v1644_v4 = vmul.f32 %v3925_v63, %v4514_v42 }
 0x485   : > { %v2207_v8 = vrot.slane %v1959_v62, 2  ;;  %1962 = vxpose.xlu1.c.b16.start.end [1/1] (short) (narrow) %v1959_v62, 64  ;;  %v1643_v61 = vmul.f32 %v3927_v0, %v4512_v41  ;;  %v1459_v30 = vpack.c.bf16 %v1451_v22, %v1451_v22 }
 0x487   : > { %2209 = vxpose.xlu0.c.b16.start.end [1/1] (short) (narrow) %v2207_v8, 64  ;;  %v1649_v29 = vpack.c.bf16 %v1644_v4, %v1643_v61 }
 0x489   : > { %3661 = vmatpush3.bf16.xpose.msra.mxu1 %v1658_v2  ;;  %v1661_v7 = vsel %vm1558_vm4, %v1649_v29, 0  ;;  %v3929_v42 = vpop.eup %3928 }
 0x48a   : > { %3662 = vmatprep.subr.bf16.mxu1 %v4032_v12  ;;  %v1645_v41 = vmul.f32 %v3929_v42, %v4526_v50 }
 0x491   : > { %3663 = vmatpush3.bf16.xpose.msra.mxu1 %v1661_v7 }
 0x492   : > { %3664 = vmatprep.subr.bf16.mxu1 %v4032_v12 }
 0x4ad   : > { %v1630_v31 = vpop.xlane.xlu0 %1629 }
 0x4ae   : > { %3930 = vrcp.f32 %v1630_v31 }
 0x4af   : > { %3932 = vrcp.f32 %v1859_v49 }
 0x4b1   : > { %v1868_v37 = vpop.xlane.xlu1 %1867 }
 0x4b5   : > { %v1862_v11 = vpop.xlane.xlu1 %1861 }
 0x4b6   : > { %3934 = vrcp.f32 %v1862_v11 }
 0x4b7   : > { %3936 = vrcp.f32 %v1868_v37 }
 0x4b8   : > { %v3931_v13 = vpop.eup %3930  ;;  %3938 = vrcp.f32 %v1865_v38 }
 0x4b9   : > { %v1877_v43 = vpop.xlane.xlu1 %1876  ;;  %v1646_v14 = vmul.f32 %v3931_v13, %v4540_v9  ;;  %v3933_v48 = vpop.eup %3932 }
 0x4ba   : > { %v1889_v26 = vmul.f32 %v3933_v48, %v4520_v27 }
 0x4bb   : > { %v1650_v46 = vpack.c.bf16 %v1646_v14, %v1645_v41 }
 0x4bd   : > { %v1871_v17 = vpop.xlane.xlu1 %1870  ;;  %v1664_v19 = vsel %vm1558_vm4, %v1650_v46, 0 }
 0x4be   : > { %3665 = vmatpush3.bf16.xpose.msra.mxu1 %v1664_v19  ;;  %3940 = vrcp.f32 %v1871_v17 }
 0x4c0   : > { %v3935_v24 = vpop.eup %3934 }
 0x4c1   : > { %v1880_v25 = vpop.xlane.xlu1 %1879  ;;  %v1890_v33 = vmul.f32 %v3935_v24, %v4550_v16  ;;  %v3937_v34 = vpop.eup %3936 }
 0x4c2   : > { %v3939_v36 = vpop.eup %3938  ;;  %v1892_v44 = vmul.f32 %v3937_v34, %v4545_v39 }
 0x4c3   : > { %v1897_v50 = vpack.c.bf16 %v1890_v33, %v1889_v26  ;;  %v1891_v1 = vmul.f32 %v3939_v36, %v4510_v40 }
 0x4c5   : > { %3667 = vmatmul.mubr.msk.bf16.vlgmr.msra.gmra.mrb[12].mxu1 %vm1558_vm4, %v1459_v30  ;;  %v1874_v9 = vpop.xlane.xlu1 %1873  ;;  %v1907_v38 = vsel %vm1558_vm4, %v1897_v50, 0  ;;  %v1898_v16 = vpack.c.bf16 %v1892_v44, %v1891_v1 }
 0x4c6   : > { %3942 = vrcp.f32 %v1874_v9  ;;  %3681 = vmatpush3.bf16.xpose.msra.mxu0 %v1907_v38 }
 0x4c7   : > { %3682 = vmatprep.subr.bf16.mxu0 %v4032_v12  ;;  %3944 = vrcp.f32 %v1880_v25  ;;  %v1910_v49 = vsel %vm1558_vm4, %v1898_v16, 0 }
 0x4c8   : > { %3946 = vrcp.f32 %v1877_v43  ;;  %v3941_v51 = vpop.eup %3940 }
 0x4c9   : > { %v1380_v27 = vpop.permute.xlu1 %1379  ;;  %v1893_v40 = vmul.f32 %v3941_v51, %v4558_v20  ;;  %v1902_v20 = vrot.slane %v1459_v30, 2 }
 0x4ca   : > { %v1446_v45 = vadd.f32 %v4415_v6, %v1380_v27 }
 0x4cc   : > { %v1960_v47 = vpack.c.bf16 %v1446_v45, %v1446_v45 }
 0x4ce   : > { %3683 = vmatpush3.bf16.xpose.msra.mxu0 %v1910_v49  ;;  %3774 = vmatprep.subr.msk.bf16.mxu1 %vm1489_vm2, %v1960_v47  ;;  %v1991_v39 = vsel %vm1489_vm2, %v1960_v47, 0  ;;  %v2226_v60 = vrot.slane %v1960_v47, 2 }
 0x4cf   : > { %3693 = vmatpush3.bf16.msra.mxu1 %v1991_v39  ;;  %3684 = vmatprep.subr.bf16.mxu0 %v4032_v12 }
 0x4d0   : > { %v3943_v52 = vpop.eup %3942  ;;  %3702 = vmatprep.subr.bf16.mxu1 %v4032_v12 }
 0x4d1   : > { %v1894_v53 = vmul.f32 %v3943_v52, %v4566_v23  ;;  %v3945_v6 = vpop.eup %3944  ;;  %v2240_v23 = vsel %vm1489_vm2, %v2226_v60, 0 }
 0x4d2   : > { %v3947_v55 = vpop.eup %3946  ;;  %v1896_v57 = vmul.f32 %v3945_v6, %v4562_v21 }
 0x4d3   : > { %v1899_v54 = vpack.c.bf16 %v1894_v53, %v1893_v40  ;;  %v1895_v58 = vmul.f32 %v3947_v55, %v4554_v18 }
 0x4d5   : > { %v1913_v56 = vsel %vm1558_vm4, %v1899_v54, 0  ;;  %v1900_v59 = vpack.c.bf16 %v1896_v57, %v1895_v58 }
 0x4d6   : > { %3685 = vmatpush3.bf16.xpose.msra.mxu0 %v1913_v56 }
 0x4d7   : > { %3686 = vmatprep.subr.bf16.mxu0 %v4032_v12  ;;  %v1916_v62 = vsel %vm1558_vm4, %v1900_v59, 0 }
 0x4de   : > { %3687 = vmatpush3.bf16.xpose.msra.mxu0 %v1916_v62 }
 0x4df   : > { %3775 = vmatprep.subr.msk.bf16.mxu0 %vm1489_vm2, %v2226_v60 }
 0x4e5   : > { %3689 = vmatmul.mubr.msk.bf16.vlgmr.msra.gmra.mrb[28].mxu0 %vm1558_vm4, %v1902_v20 }
 0x4e6   : > { %3715 = vmatpush3.bf16.msra.mxu0 %v2240_v23 }
 0x4e7   : > { %3724 = vmatprep.subr.bf16.mxu0 %v4032_v12 }
 0x4eb   : > { %v1970_v21 = vpop.trf.xlu1 }
 0x4ec   : > { %3694 = vmatprep.mubr.msk.bf16.mxu1 %vm1476_vm3, %v1970_v21 }
 0x4ed   : > { %v2217_v35 = vpop.trf.xlu0 }
 0x4ee   : > { %3716 = vmatprep.mubr.msk.bf16.mxu0 %vm1476_vm3, %v2217_v35 }
 0x4ef   : > { %v1971_v18 = vpop.trf.xlu1 }
 0x4f0   : > { %3695 = vmatmul.mubr.msk.bf16.vlgmr.msra.gmra.mrb[16].mxu1 %vm1476_vm3, %v1971_v18 }
 0x4f1   : > { %v2218_v63 = vpop.trf.xlu0 }
 0x4f2   : > { %3717 = vmatmul.mubr.msk.bf16.vlgmr.msra.gmra.mrb[32].mxu0 %vm1476_vm3, %v2218_v63 }
 0x4f3   : > { %v1972_v8 = vpop.trf.xlu1 }
 0x4f4   : > { %3698 = vmatprep.mubr.msk.bf16.mxu1 %vm1476_vm3, %v1972_v8 }
 0x4f5   : > { %v2219_v0 = vpop.trf.xlu0 }
 0x4f6   : > { %3720 = vmatprep.mubr.msk.bf16.mxu0 %vm1476_vm3, %v2219_v0 }
 0x4f7   : > { %v1973_v2 = vpop.trf.xlu1 }
 0x4f8   : > { %3699 = vmatmul.mubr.msk.bf16.gmra.mrb[20].mxu1 %vm1476_vm3, %v1973_v2 }
 0x4f9   : > { %v2220_v4 = vpop.trf.xlu0  ;;  %3710 = vmatprep.mubr.msk.bf16.mxu1 %vm4033_vm0, %v4032_v12 }
 0x4fa   : > { %3721 = vmatmul.mubr.msk.bf16.gmra.mrb[36].mxu0 %vm1476_vm3, %v2220_v4 }
 0x4fb   : > { %3732 = vmatprep.mubr.msk.bf16.mxu0 %vm4033_vm0, %v4032_v12 }
 0x598   : > { %v1700_v61 = vpop.f32.mrb[12].mxu1 }
 0x599   : > { %1707 = vst.msk [vmem:[#allocation2] sm:$0xf] %vm1706_vm5, %v1700_v61  ;;  %v3668_v29 = vpop.f32.mrb[13].mxu1 }
 0x59a   : > { %v1703_v7 = vpop.f32.mrb[14].mxu1 }
 0x59b   : > { %v3669_v3 = vpop.f32.mrb[15].mxu1 }
 0x5b8   : > { %v1952_v10 = vpop.f32.mrb[28].mxu0 }
 0x5b9   : > { %1958 = vst.msk [vmem:[#allocation2 + $0x4] sm:$0xf] %vm1706_vm5, %v1952_v10  ;;  %v3690_v31 = vpop.f32.mrb[29].mxu0 }
 0x5ba   : > { %v1955_v37 = vpop.f32.mrb[30].mxu0 }
 0x5bb   : > { %v3691_v11 = vpop.f32.mrb[31].mxu0 }
 0x5c3   : > { %v4628_v42 = vpop.f32.mrb[16].mxu1 }
 0x5c4   : > { %v4630_v13 = vpop.f32.mrb[17].mxu1  ;;  %v2064_v27 = vsel %vm1558_vm4, %v4628_v42, -inf }
 0x5c5   : > { %v3697_v43 = vpop.f32.mrb[18].mxu1  ;;  %v4632_v41 = vpop.f32.mrb[32].mxu0  ;;  %v2058_v14 = vsel %vm1558_vm4, %v4630_v13, -inf }
 0x5c6   : > { %v4636_v46 = vpop.f32.mrb[33].mxu0  ;;  %2059 = vmax.xlane.f32.xlu1 %v2058_v14  ;;  %v2030_v17 = vpop.f32.mrb[19].mxu1  ;;  %v2067_v25 = vsel %vm1558_vm4, %v3697_v43, -inf  ;;  %v2313_v45 = vsel %vm1558_vm4, %v4632_v41, -inf }
 0x5c7   : > { %v3719_v19 = vpop.f32.mrb[34].mxu0  ;;  %v2061_v48 = vsel %vm1558_vm4, %v2030_v17, -inf  ;;  %v2307_v22 = vsel %vm1558_vm4, %v4636_v46, -inf }
 0x5c8   : > { %v2279_v24 = vpop.f32.mrb[35].mxu0  ;;  %2062 = vmax.xlane.f32.xlu0 %v2061_v48  ;;  %v2316_v38 = vsel %vm1558_vm4, %v3719_v19, -inf }
 0x5c9   : > { %v2310_v34 = vsel %vm1558_vm4, %v2279_v24, -inf }
 0x5ca   : > { %2308 = vmax.xlane.f32.xlu1 %v2307_v22 }
 0x5cb   : > { %v4642_v26 = vpop.f32.mrb[20].mxu1 }
 0x5cc   : > { %2068 = vmax.xlane.f32.xlu0 %v2067_v25  ;;  %v4644_v33 = vpop.f32.mrb[21].mxu1  ;;  %v2076_v40 = vsel %vm1558_vm4, %v4642_v26, -inf }
 0x5cd   : > { %v4647_v30 = vpop.f32.mrb[22].mxu1  ;;  %v4649_v50 = vpop.f32.mrb[36].mxu0  ;;  %v2070_v49 = vsel %vm1558_vm4, %v4644_v33, -inf }
 0x5ce   : > { %2311 = vmax.xlane.f32.xlu1 %v2310_v34  ;;  %v2046_v36 = vpop.f32.mrb[23].mxu1  ;;  %v4651_v9 = vpop.f32.mrb[37].mxu0  ;;  %v2079_v51 = vsel %vm1558_vm4, %v4647_v30, -inf  ;;  %v2325_v53 = vsel %vm1558_vm4, %v4649_v50, -inf }
 0x5cf   : > { %v4654_v44 = vpop.f32.mrb[38].mxu0  ;;  %v2073_v16 = vsel %vm1558_vm4, %v2046_v36, -inf  ;;  %v2319_v39 = vsel %vm1558_vm4, %v4651_v9, -inf }
 0x5d0   : > { %2317 = vmax.xlane.f32.xlu0 %v2316_v38  ;;  %v4656_v1 = vpop.f32.mrb[39].mxu0  ;;  %v2328_v52 = vsel %vm1558_vm4, %v4654_v44, -inf }
 0x5d1   : > { %v2322_v47 = vsel %vm1558_vm4, %v4656_v1, -inf }
 0x5d2   : > { %2065 = vmax.xlane.f32.xlu1 %v2064_v27 }
 0x5d4   : > { %2074 = vmax.xlane.f32.xlu0 %v2073_v16 }
 0x5d6   : > { %2314 = vmax.xlane.f32.xlu1 %v2313_v45 }
 0x5d8   : > { %2323 = vmax.xlane.f32.xlu0 %v2322_v47 }
 0x5da   : > { %2071 = vmax.xlane.f32.xlu1 %v2070_v49 }
 0x5dc   : > { %2080 = vmax.xlane.f32.xlu0 %v2079_v51 }
 0x5de   : > { %2320 = vmax.xlane.f32.xlu1 %v2319_v39 }
 0x5e0   : > { %2329 = vmax.xlane.f32.xlu0 %v2328_v52 }
 0x5e2   : > { %2077 = vmax.xlane.f32.xlu1 %v2076_v40 }
 0x5e6   : > { %2326 = vmax.xlane.f32.xlu1 %v2325_v53 }
 0x653   : > { %v2060_v6 = vpop.xlane.xlu1 %2059 }
 0x654   : > { %v2082_v20 = vsub.f32 %v4630_v13, %v2060_v6 }
 0x655   : > { %v2063_v54 = vpop.xlane.xlu0 %2062 }
 0x656   : > { %v2083_v55 = vsub.f32 %v2030_v17, %v2063_v54  ;;  %v2090_v0 = vmul.f32 1.442695, %v2082_v20 }
 0x657   : > { %v2309_v56 = vpop.xlane.xlu1 %2308 }
 0x658   : > { %v2092_v57 = vmul.f32 1.442695, %v2083_v55  ;;  %v2331_v2 = vsub.f32 %v4636_v46, %v2309_v56 }
 0x659   : > { %v2069_v58 = vpop.xlane.xlu0 %2068 }
 0x65a   : > { %3948 = vpow2.f32 %v2092_v57  ;;  %v2085_v59 = vsub.f32 %v3697_v43, %v2069_v58  ;;  %v2339_v31 = vmul.f32 1.442695, %v2331_v2 }
 0x65b   : > { %v2312_v60 = vpop.xlane.xlu1 %2311 }
 0x65c   : > { %v2332_v62 = vsub.f32 %v2279_v24, %v2312_v60  ;;  %v2096_v21 = vmul.f32 1.442695, %v2085_v59 }
 0x65d   : > { %v2318_v23 = vpop.xlane.xlu0 %2317 }
 0x65e   : > { %v2341_v35 = vmul.f32 1.442695, %v2332_v62  ;;  %v2334_v18 = vsub.f32 %v3719_v19, %v2318_v23 }
 0x65f   : > { %v2066_v63 = vpop.xlane.xlu1 %2065 }
 0x660   : > { %3950 = vpow2.f32 %v2341_v35  ;;  %v2084_v8 = vsub.f32 %v4628_v42, %v2066_v63  ;;  %v2345_v61 = vmul.f32 1.442695, %v2334_v18 }
 0x661   : > { %v2075_v4 = vpop.xlane.xlu0 %2074  ;;  %3952 = vpow2.f32 %v2096_v21 }
 0x662   : > { %v2094_v29 = vmul.f32 1.442695, %v2084_v8  ;;  %v2087_v7 = vsub.f32 %v2046_v36, %v2075_v4 }
 0x663   : > { %v2315_v3 = vpop.xlane.xlu1 %2314 }
 0x664   : > { %v4680_v10 = vpop.eup %3948  ;;  %3954 = vpow2.f32 %v2094_v29  ;;  %v2333_v37 = vsub.f32 %v4632_v41, %v2315_v3  ;;  %v2100_v13 = vmul.f32 1.442695, %v2087_v7  ;;  %v2466_v7 = vld [vmem:[%s4988_s10] sm:$0xff]  ;;  %v1371_v3 = vld [vmem:[%s4986_s8 + $0x18] sm:$0xff] }
 0x665   : > { %3956 = vpow2.f32 %v2090_v0  ;;  %v2324_v11 = vpop.xlane.xlu0 %2323  ;;  %v2109_v42 = vsel %vm1558_vm4, %v4680_v10, 0.0 }
 0x666   : > { %3958 = vpow2.f32 %v2345_v61  ;;  %v2336_v43 = vsub.f32 %v4656_v1, %v2324_v11  ;;  %2110 = vadd.xlane.f32.xlu0 %v2109_v42  ;;  %v2343_v46 = vmul.f32 1.442695, %v2333_v37  ;;  %v2467_v37 = vld [vmem:[%s4988_s10 + $0x8] sm:$0xff]  ;;  %v2468_v42 = vld [vmem:[%s4988_s10 + $0x10] sm:$0xff] }
 0x667   : > { %v2072_v14 = vpop.xlane.xlu1 %2071  ;;  %3960 = vpow2.f32 %v2339_v31  ;;  %v2469_v31 = vld [vmem:[%s4988_s10 + $0x18] sm:$0xff]  ;;  %v2564_v11 = vld [vmem:[%s4990_s12 + $0x8] sm:$0xff] }
 0x668   : > { %v2086_v17 = vsub.f32 %v4644_v33, %v2072_v14  ;;  %3962 = vpow2.f32 %v2100_v13  ;;  %v2349_v22 = vmul.f32 1.442695, %v2336_v43  ;;  %v2631_v13 = vld [vmem:[%s4992_s14 + $0x8] sm:$0xff]  ;;  %v2563_v43 = vld [vmem:[%s4990_s12] sm:$0xff] }
 0x669   : > { %v2081_v19 = vpop.xlane.xlu0 %2080  ;;  %3964 = vpow2.f32 %v2343_v46  ;;  %v2630_v14 = vld [vmem:[%s4992_s14] sm:$0xff] }
 0x66a   : > { %v4687_v48 = vpop.eup %3950  ;;  %v2089_v41 = vsub.f32 %v4647_v30, %v2081_v19  ;;  %v2098_v36 = vmul.f32 1.442695, %v2086_v17  ;;  %3966 = vpow2.f32 %v2349_v22 }
 0x66b   : > { %v2321_v24 = vpop.xlane.xlu1 %2320  ;;  %v2358_v25 = vsel %vm1558_vm4, %v4687_v48, 0.0  ;;  %v4692_v34 = vpop.eup %3952 }
 0x66c   : > { %2359 = vadd.xlane.f32.xlu0 %v2358_v25  ;;  %v2104_v33 = vmul.f32 1.442695, %v2089_v41  ;;  %v2115_v30 = vsel %vm1558_vm4, %v4692_v34, 0.0  ;;  %3968 = vpow2.f32 %v2098_v36 }
 0x66d   : > { %v2330_v38 = vpop.xlane.xlu0 %2329 }
 0x66e   : > { %v4694_v1 = vpop.eup %3954  ;;  %v2338_v27 = vsub.f32 %v4654_v44, %v2330_v38  ;;  %3970 = vpow2.f32 %v2104_v33  ;;  %v2335_v44 = vsub.f32 %v4651_v9, %v2321_v24 }
 0x66f   : > { %v4697_v16 = vpop.eup %3956  ;;  %v2078_v45 = vpop.xlane.xlu1 %2077  ;;  %v2112_v47 = vsel %vm1558_vm4, %v4694_v1, 0.0 }
 0x670   : > { %v4703_v49 = vpop.eup %3958  ;;  %v2088_v51 = vsub.f32 %v4642_v26, %v2078_v45  ;;  %2116 = vadd.xlane.f32.xlu0 %v2115_v30  ;;  %2113 = vadd.xlane.f32.xlu1 %v2112_v47  ;;  %v2353_v39 = vmul.f32 1.442695, %v2338_v27  ;;  %v2106_v54 = vsel %vm1558_vm4, %v4697_v16, 0.0  ;;  %v2347_v26 = vmul.f32 1.442695, %v2335_v44 }
 0x671   : > { %v4707_v40 = vpop.eup %3960  ;;  %v2364_v6 = vsel %vm1558_vm4, %v4703_v49, 0.0 }
 0x672   : > { %v2102_v52 = vmul.f32 1.442695, %v2088_v51  ;;  %v4713_v55 = vpop.eup %3962  ;;  %3972 = vpow2.f32 %v2353_v39  ;;  %v2355_v58 = vsel %vm1558_vm4, %v4707_v40, 0.0 }
 0x673   : > { %v2327_v53 = vpop.xlane.xlu1 %2326  ;;  %v4716_v9 = vpop.eup %3964  ;;  %v2121_v57 = vsel %vm1558_vm4, %v4713_v55, 0.0 }
 0x674   : > { %2365 = vadd.xlane.f32.xlu0 %v2364_v6  ;;  %2107 = vadd.xlane.f32.xlu1 %v2106_v54  ;;  %3974 = vpow2.f32 %v2102_v52  ;;  %v2337_v56 = vsub.f32 %v4649_v50, %v2327_v53  ;;  %v4722_v59 = vpop.eup %3966  ;;  %v2361_v50 = vsel %vm1558_vm4, %v4716_v9, 0.0 }
 0x675   : > { %3976 = vpow2.f32 %v2347_v26  ;;  %v2370_v20 = vsel %vm1558_vm4, %v4722_v59, 0.0 }
 0x676   : > { %v2351_v60 = vmul.f32 1.442695, %v2337_v56  ;;  %v4724_v62 = vpop.eup %3968 }
 0x677   : > { %v2118_v18 = vsel %vm1558_vm4, %v4724_v62, 0.0 }
 0x678   : > { %2122 = vadd.xlane.f32.xlu0 %v2121_v57  ;;  %2356 = vadd.xlane.f32.xlu1 %v2355_v58  ;;  %v4730_v23 = vpop.eup %3970  ;;  %3978 = vpow2.f32 %v2351_v60 }
 0x679   : > { %v2127_v35 = vsel %vm1558_vm4, %v4730_v23, 0.0 }
 0x67c   : > { %2371 = vadd.xlane.f32.xlu0 %v2370_v20  ;;  %2362 = vadd.xlane.f32.xlu1 %v2361_v50  ;;  %v4732_v21 = vpop.eup %3972 }
 0x67d   : > { %v2376_v8 = vsel %vm1558_vm4, %v4732_v21, 0.0 }
 0x67e   : > { %v4738_v63 = vpop.eup %3974 }
 0x67f   : > { %v2124_v0 = vsel %vm1558_vm4, %v4738_v63, 0.0  ;;  %v4744_v2 = vpop.eup %3976 }
 0x680   : > { %2128 = vadd.xlane.f32.xlu0 %v2127_v35  ;;  %2119 = vadd.xlane.f32.xlu1 %v2118_v18  ;;  %v2367_v4 = vsel %vm1558_vm4, %v4744_v2, 0.0 }
 0x682   : > { %v4748_v61 = vpop.eup %3978 }
 0x683   : > { %v2373_v29 = vsel %vm1558_vm4, %v4748_v61, 0.0 }
 0x684   : > { %2377 = vadd.xlane.f32.xlu0 %v2376_v8  ;;  %2125 = vadd.xlane.f32.xlu1 %v2124_v0 }
 0x688   : > { %2368 = vadd.xlane.f32.xlu1 %v2367_v4 }
 0x68c   : > { %2374 = vadd.xlane.f32.xlu1 %v2373_v29 }
 0x69a   : > { %2472 = vperm.xlu0 %3787, %v2466_v7  }
 0x69d   : > { %1389 = vperm.xlu1 %3788, %v1371_v3  }
 0x69e   : > { %2487 = vperm.xlu0 %3787, %v2469_v31  }
 0x6a1   : > { %2477 = vperm.xlu1 %3788, %v2467_v37  }
 0x6a2   : > { %2572 = vperm.xlu0 %3787, %v2564_v11  }
 0x6a5   : > { %2482 = vperm.xlu1 %3788, %v2468_v42  }
 0x6a6   : > { %2639 = vperm.xlu0 %3787, %v2631_v13  }
 0x6a9   : > { %2567 = vperm.xlu1 %3788, %v2563_v43  }
 0x6ad   : > { %2634 = vperm.xlu1 %3788, %v2630_v14  }
 0x6f3   : > { %v2111_v46 = vpop.xlane.xlu0 %2110 }
 0x6f4   : > { %3980 = vrcp.f32 %v2111_v46 }
 0x6f9   : > { %v2360_v17 = vpop.xlane.xlu0 %2359 }
 0x6fa   : > { %3982 = vrcp.f32 %v2360_v17 }
 0x6fd   : > { %v2117_v19 = vpop.xlane.xlu0 %2116  ;;  %v2114_v22 = vpop.xlane.xlu1 %2113 }
 0x6fe   : > { %v3981_v33 = vpop.eup %3980 }
 0x6ff   : > { %v2139_v44 = vmul.f32 %v3981_v33, %v4680_v10 }
 0x701   : > { %v2366_v41 = vpop.xlane.xlu0 %2365  ;;  %v2108_v24 = vpop.xlane.xlu1 %2107 }
 0x702   : > { %3984 = vrcp.f32 %v2108_v24 }
 0x703   : > { %3986 = vrcp.f32 %v2117_v19 }
 0x704   : > { %3988 = vrcp.f32 %v2114_v22  ;;  %v3983_v27 = vpop.eup %3982 }
 0x705   : > { %v2357_v25 = vpop.xlane.xlu1 %2356  ;;  %v2123_v36 = vpop.xlane.xlu0 %2122  ;;  %v2388_v26 = vmul.f32 %v3983_v27, %v4687_v48 }
 0x706   : > { %3990 = vrcp.f32 %v2357_v25 }
 0x707   : > { %3992 = vrcp.f32 %v2366_v41 }
 0x709   : > { %v2363_v38 = vpop.xlane.xlu1 %2362  ;;  %v2372_v45 = vpop.xlane.xlu0 %2371 }
 0x70a   : > { %3994 = vrcp.f32 %v2363_v38 }
 0x70b   : > { %3996 = vrcp.f32 %v2123_v36 }
 0x70c   : > { %v3985_v30 = vpop.eup %3984 }
 0x70d   : > { %v2120_v47 = vpop.xlane.xlu1 %2119  ;;  %v3987_v51 = vpop.eup %3986  ;;  %v2138_v39 = vmul.f32 %v3985_v30, %v4697_v16 }
 0x70e   : > { %v3989_v52 = vpop.eup %3988  ;;  %3998 = vrcp.f32 %v2120_v47  ;;  %v2129_v56 = vpop.xlane.xlu0 %2128  ;;  %v2141_v20 = vmul.f32 %v3987_v51, %v4692_v34 }
 0x70f   : > { %v2146_v53 = vpack.c.bf16 %v2139_v44, %v2138_v39  ;;  %v2140_v60 = vmul.f32 %v3989_v52, %v4694_v1  ;;  %4000 = vrcp.f32 %v2372_v45  ;;  %v2457_v52 = vld [vmem:[#allocation2] sm:$0xff] }
 0x710   : > { %v3991_v6 = vpop.eup %3990 }
 0x711   : > { %v2126_v54 = vpop.xlane.xlu1 %2125  ;;  %v2154_v57 = vsel %vm1558_vm4, %v2146_v53, 0  ;;  %v2387_v58 = vmul.f32 %v3991_v6, %v4707_v40  ;;  %v3993_v16 = vpop.eup %3992  ;;  %v2147_v18 = vpack.c.bf16 %v2141_v20, %v2140_v60  ;;  %v2459_v6 = vadd.f32 %v2457_v52, %v4379_v28 }
 0x712   : > { %3703 = vmatpush3.bf16.xpose.msra.mxu1 %v2154_v57  ;;  %4002 = vrcp.f32 %v2126_v54  ;;  %v2378_v40 = vpop.xlane.xlu0 %2377  ;;  %v2390_v34 = vmul.f32 %v3993_v16, %v4703_v49 }
 0x713   : > { %v2395_v10 = vpack.c.bf16 %v2388_v26, %v2387_v58  ;;  %3704 = vmatprep.subr.bf16.mxu1 %v4032_v12  ;;  %v2157_v29 = vsel %vm1558_vm4, %v2147_v18, 0 }
 0x714   : > { %v3995_v50 = vpop.eup %3994 }
 0x715   : > { %v2369_v35 = vpop.xlane.xlu1 %2368  ;;  %v2405_v48 = vsel %vm1558_vm4, %v2395_v10, 0  ;;  %v2389_v8 = vmul.f32 %v3995_v50, %v4716_v9  ;;  %v3997_v1 = vpop.eup %3996 }
 0x716   : > { %4004 = vrcp.f32 %v2369_v35  ;;  %3725 = vmatpush3.bf16.xpose.msra.mxu0 %v2405_v48  ;;  %v2143_v9 = vmul.f32 %v3997_v1, %v4713_v55 }
 0x717   : > { %4006 = vrcp.f32 %v2129_v56  ;;  %3726 = vmatprep.subr.bf16.mxu0 %v4032_v12  ;;  %v2396_v7 = vpack.c.bf16 %v2390_v34, %v2389_v8  ;;  %v3857_v56 = vld [vmem:[%s4987_s9 + $0x8] sm:$0xff]  }
 0x718   : > { %v3999_v0 = vpop.eup %3998 }
 0x719   : > { %v2375_v4 = vpop.xlane.xlu1 %2374  ;;  %v2142_v3 = vmul.f32 %v3999_v0, %v4724_v62  ;;  %v4001_v31 = vpop.eup %4000  ;;  %v2408_v37 = vsel %vm1558_vm4, %v2396_v7, 0  ;;  %v3860_v7 = vld [vmem:[%s4996_s18] ss:$16 sps:$4 sm:$0xff]  }
 0x71a   : > { %4008 = vrcp.f32 %v2375_v4  ;;  %3705 = vmatpush3.bf16.xpose.msra.mxu1 %v2157_v29  ;;  %v2392_v62 = vmul.f32 %v4001_v31, %v4722_v59  ;;  %v2473_v58 = vpop.permute.xlu0 %2472  ;;  %v3858_v29 = vld [vmem:[%s4989_s11] sm:$0xff]  }
 0x71b   : > { %4010 = vrcp.f32 %v2378_v40  ;;  %3706 = vmatprep.subr.bf16.mxu1 %v4032_v12  ;;  %v2148_v11 = vpack.c.bf16 %v2143_v9, %v2142_v3  ;;  %v3862_v3 = vld [vmem:[%s4996_s18 + $0x4] ss:$16 sps:$4 sm:$0xff]   ;;  %v3866_v31 = vld [vmem:[%s4996_s18 + $0x20] ss:$16 sps:$4 sm:$0xff]  }
 0x71c   : > { %v4003_v42 = vpop.eup %4002  ;;  %v3868_v9 = vld [vmem:[%s4996_s18 + $0x24] ss:$16 sps:$4 sm:$0xff]  }
 0x71d   : > { %v2160_v14 = vsel %vm1558_vm4, %v2148_v11, 0  ;;  %v2144_v46 = vmul.f32 %v4003_v42, %v4738_v63  ;;  %v3872_v11 = vld [vmem:[%s4996_s18 + $0x40] ss:$16 sps:$4 sm:$0xff]  }
 0x71e   : > { %3727 = vmatpush3.bf16.xpose.msra.mxu0 %v2408_v37  ;;  %v2488_v16 = vpop.permute.xlu0 %2487  ;;  %v3874_v37 = vld [vmem:[%s4996_s18 + $0x44] ss:$16 sps:$4 sm:$0xff]  }
 0x71f   : > { %3728 = vmatprep.subr.bf16.mxu0 %v4032_v12 }
 0x720   : > { %v4005_v49 = vpop.eup %4004 }
 0x721   : > { %v4007_v13 = vpop.eup %4006  ;;  %v2391_v43 = vmul.f32 %v4005_v49, %v4744_v2  ;;  %v1390_v2 = vpop.permute.xlu1 %1389 }
 0x722   : > { %3707 = vmatpush3.bf16.xpose.msra.mxu1 %v2160_v14  ;;  %v2145_v19 = vmul.f32 %v4007_v13, %v4730_v23  ;;  %v1454_v38 = vadd.f32 %v4413_v5, %v1390_v2  ;;  %v3869_v2 = vld [vmem:[%s4996_s18 + $0x28] ss:$16 sps:$4 sm:$0xff]  }
 0x723   : > { %v2397_v55 = vpack.c.bf16 %v2392_v62, %v2391_v43  ;;  %3708 = vmatprep.subr.bf16.mxu1 %v4032_v12  ;;  %v2573_v62 = vpop.permute.xlu0 %2572 }
 0x724   : > { %v4009_v17 = vpop.eup %4008  ;;  %v2149_v24 = vpack.c.bf16 %v2145_v19, %v2144_v46  ;;  %v1961_v33 = vpack.c.bf16 %v1454_v38, %v1454_v38  ;;  %v3880_v38 = vld [vmem:[%s4996_s18 + $0x64] ss:$16 sps:$4 sm:$0xff]  }
 0x725   : > { %v4011_v22 = vpop.eup %4010  ;;  %v2411_v41 = vsel %vm1558_vm4, %v2397_v55, 0  ;;  %v2393_v25 = vmul.f32 %v4009_v17, %v4748_v61  ;;  %v2478_v57 = vpop.permute.xlu1 %2477 }
 0x726   : > { %3729 = vmatpush3.bf16.xpose.msra.mxu0 %v2411_v41  ;;  %v2394_v59 = vmul.f32 %v4011_v22, %v4732_v21  ;;  %v2163_v63 = vsel %vm1558_vm4, %v2149_v24, 0  ;;  %v2400_v27 = vrot.slane %v1961_v33, 2  ;;  %v3856_v21 = vld [vmem:[%s4987_s9] sm:$0xff]   ;;  %v3865_v22 = vld [vmem:[%s4996_s18 + $0xc] ss:$16 sps:$4 sm:$0xff]  }
 0x727   : > { %3730 = vmatprep.subr.bf16.mxu0 %v4032_v12  ;;  %v3859_v24 = vld [vmem:[%s4991_s13] sm:$0xff]  }
 0x728   : > { %v2398_v36 = vpack.c.bf16 %v2394_v59, %v2393_v25  ;;  %v3863_v25 = vld [vmem:[%s4996_s18 + $0x8] ss:$16 sps:$4 sm:$0xff]   ;;  %v3871_v59 = vld [vmem:[%s4996_s18 + $0x2c] ss:$16 sps:$4 sm:$0xff]  }
 0x729   : > { %v2483_v60 = vpop.permute.xlu1 %2482 }
 0x72a   : > { %3709 = vmatpush3.bf16.xpose.msra.mxu1 %v2163_v63  ;;  %v2414_v23 = vsel %vm1558_vm4, %v2398_v36, 0  ;;  %v3877_v63 = vld [vmem:[%s4996_s18 + $0x4c] ss:$16 sps:$4 sm:$0xff]   ;;  %v3875_v36 = vld [vmem:[%s4996_s18 + $0x48] ss:$16 sps:$4 sm:$0xff]  }
 0x72d   : > { %v2568_v42 = vpop.permute.xlu1 %2567 }
 0x72e   : > { %3731 = vmatpush3.bf16.xpose.msra.mxu0 %v2414_v23  ;;  %v3878_v23 = vld [vmem:[%s4996_s18 + $0x60] ss:$16 sps:$4 sm:$0xff]  }
 0x72f   : > { %2792 = vmatprep.subr.bf16.mxu0 %v3862_v3 }
 0x731   : > { %3711 = vmatmul.mubr.msk.bf16.vlgmr.msra.gmra.mrb[24].mxu1 %vm1558_vm4, %v1961_v33  ;;  %v3881_v33 = vld [vmem:[%s4996_s18 + $0x68] ss:$16 sps:$4 sm:$0xff]  }
 0x732   : > { %3738 = vmatprep.mubr.msk.bf16.mxu1 %vm1319_vm1, %v3856_v21  ;;  %v2640_v21 = vpop.permute.xlu0 %2639 }
 0x735   : > { %3733 = vmatmul.mubr.msk.bf16.vlgmr.msra.gmra.mrb[40].mxu0 %vm1558_vm4, %v2400_v27 }
 0x736   : > { %2824 = vmatprep.mubr.bf16.mxu0 %v4034_v15  ;;  %2793 = vmatpush1.bf16.msra.mxu0 %v3860_v7 }
 0x737   : > { %2794 = vmatprep.subr.bf16.mxu0 %v3868_v9  ;;  %v3248_v9 = vld [vmem:[%s4993_s15 + $0x8] sm:$0xff] }
 0x73a   : > { %2795 = vmatpush1.bf16.msra.mxu0 %v3866_v31  ;;  %v3247_v31 = vld [vmem:[%s4993_s15] sm:$0xff] }
 0x73b   : > { %2796 = vmatprep.subr.bf16.mxu0 %v3874_v37 }
 0x73e   : > { %2797 = vmatpush1.bf16.msra.mxu0 %v3872_v11 }
 0x73f   : > { %2798 = vmatprep.subr.bf16.mxu0 %v3880_v38 }
 0x742   : > { %2799 = vmatpush1.bf16.msra.mxu0 %v3878_v23 }
 0x804   : > { %v2199_v61 = vpop.f32.mrb[24].mxu1 }
 0x805   : > { %2205 = vst.msk [vmem:[#allocation2 + $0x8] sm:$0xf] %vm1706_vm5, %v2199_v61  ;;  %v3712_v5 = vpop.f32.mrb[25].mxu1 }
 0x806   : > { %v2202_v45 = vpop.f32.mrb[26].mxu1  ;;  %v2635_v5 = vpop.permute.xlu1 %2634 }
 0x807   : > { %v3713_v30 = vpop.f32.mrb[27].mxu1 }
 0x808   : > { %v2450_v47 = vpop.f32.mrb[40].mxu0 }
 0x809   : > { %2456 = vst.msk [vmem:[#allocation2 + $0xc] sm:$0xf] %vm1706_vm5, %v2450_v47  ;;  %v3734_v51 = vpop.f32.mrb[41].mxu0 }
 0x80a   : > { %v2453_v39 = vpop.f32.mrb[42].mxu0 }
 0x80b   : > { %v3735_v44 = vpop.f32.mrb[43].mxu0 }
 0x810   : > { %v2458_v53 = vld [vmem:[#allocation2 + $0x8] sm:$0xff] }
 0x811   : > { %v2460_v54 = vadd.f32 %v2458_v53, %v4387_v32 }
 0x813   : > { %v2465_v26 = vpack.c.bf16 %v2460_v54, %v2459_v6 }
 0x815   : > { %3736 = vmatprep.subr.bf16.mxu1 %v2465_v26 }
 0x816   : > { %3737 = vmatpush3.bf16.msra.mxu1 %v2465_v26 }
 0x817   : > { %3742 = vmatprep.subr.bf16.mxu1 %v4032_v12 }
 0x819   : > { %3739 = vmatmul.mubr.msk.bf16.vlgmr.msra.gmra.mrb[28].mxu1 %vm1319_vm1, %v3857_v56 }
 0x81a   : > { %3746 = vmatprep.mubr.msk.bf16.mxu1 %vm4033_vm0, %v4032_v12 }
 0x8ec   : > { %v3740_v28 = vpop.f32.mrb[28].mxu1 }
 0x8ed   : > { %v2549_v20 = vadd.f32 %v3740_v28, %v2483_v60  ;;  %v2540_v32 = vpop.f32.mrb[29].mxu1 }
 0x8ee   : > { %v2541_v10 = vadd.f32 %v2540_v32, %v2473_v58  ;;  %v3741_v50 = vpop.f32.mrb[30].mxu1  ;;  %v2878_v32 = vld [vmem:[%s4995_s17] sm:$0xff] }
 0x8ef   : > { %v2552_v35 = vadd.f32 %v3741_v50, %v2488_v16  ;;  %v2543_v48 = vpop.f32.mrb[31].mxu1  ;;  %v2557_v8 = vmax.f32 %v2549_v20, 0.0  ;;  %v2879_v16 = vld [vmem:[%s4995_s17 + $0x8] sm:$0xff] }
 0x8f0   : > { %v2544_v18 = vadd.f32 %v2543_v48, %v2478_v57  ;;  %v2555_v40 = vmax.f32 %v2541_v10, 0.0 }
 0x8f1   : > { %v2558_v1 = vmax.f32 %v2552_v35, 0.0 }
 0x8f2   : > { %v2556_v34 = vmax.f32 %v2544_v18, 0.0 }
 0x8f3   : > { %v2562_v0 = vpack.c.bf16 %v2558_v1, %v2557_v8 }
 0x8f4   : > { %v2561_v4 = vpack.c.bf16 %v2556_v34, %v2555_v40 }
 0x8f6   : > { %3743 = vmatpush3.bf16.msra.mxu1 %v2561_v4 }
 0x8f7   : > { %3744 = vmatprep.subr.bf16.mxu1 %v4032_v12 }
 0x8fa   : > { %3745 = vmatpush3.bf16.msra.mxu1 %v2562_v0 }
 0x8fb   : > { %3750 = vmatprep.subr.bf16.mxu1 %v4032_v12 }
 0x8fd   : > { %3747 = vmatmul.mubr.msk.bf16.vlgmr.msra.gmra.mrb[32].mxu1 %vm2580_vm6, %v3858_v29 }
 0x8fe   : > { %3752 = vmatprep.mubr.msk.bf16.mxu1 %vm4033_vm0, %v4032_v12 }
 0x9d0   : > { %v2618_v49 = vpop.f32.mrb[32].mxu1 }
 0x9d1   : > { %v2619_v13 = vadd.f32 %v2618_v49, %v2568_v42  ;;  %v3748_v43 = vpop.f32.mrb[33].mxu1 }
 0x9d2   : > { %v2621_v14 = vpop.f32.mrb[34].mxu1 }
 0x9d3   : > { %v2622_v46 = vadd.f32 %v2621_v14, %v2573_v62  ;;  %v3749_v55 = vpop.f32.mrb[35].mxu1  ;;  %v2625_v17 = vadd.f32 %v2619_v13, %v2459_v6 }
 0x9d5   : > { %v2626_v19 = vadd.f32 %v2622_v46, %v2460_v54 }
 0x9d7   : > { %v2629_v41 = vpack.c.bf16 %v2626_v19, %v2625_v17 }
 0x9d9   : > { %3751 = vmatpush3.bf16.msra.mxu1 %v2629_v41 }
 0x9da   : > { %2835 = vmatprep.subr.bf16.mxu1 %v3865_v22 }
 0x9dc   : > { %3753 = vmatmul.mubr.msk.bf16.vlgmr.msra.gmra.mrb[36].mxu1 %vm1319_vm1, %v3859_v24 }
 0x9dd   : > { %2836 = vmatpush1.bf16.msra.mxu1 %v3863_v25  ;;  %2867 = vmatprep.mubr.bf16.mxu1 %v4034_v15  ;;  %v3883_v15 = vld [vmem:[%s4996_s18 + $0x6c] ss:$16 sps:$4 sm:$0xff]  }
 0x9de   : > { %2837 = vmatprep.subr.bf16.mxu1 %v3871_v59 }
 0x9e1   : > { %2838 = vmatpush1.bf16.msra.mxu1 %v3869_v2 }
 0x9e2   : > { %2839 = vmatprep.subr.bf16.mxu1 %v3877_v63 }
 0x9e5   : > { %2840 = vmatpush1.bf16.msra.mxu1 %v3875_v36 }
 0x9e6   : > { %2841 = vmatprep.subr.bf16.mxu1 %v3883_v15 }
 0x9e9   : > { %2842 = vmatpush1.bf16.msra.mxu1 %v3881_v33 }
 0xaaf   : > { %v2684_v27 = vpop.f32.mrb[36].mxu1 }
 0xab0   : > { %v3754_v61 = vpop.f32.mrb[37].mxu1  ;;  %v2685_v30 = vadd.f32 %v2684_v27, %v2635_v5 }
 0xab1   : > { %v2687_v45 = vpop.f32.mrb[38].mxu1 }
 0xab2   : > { %v2688_v47 = vadd.f32 %v2687_v45, %v2640_v21  ;;  %v3755_v51 = vpop.f32.mrb[39].mxu1 }
 0xab4   : > { %v2691_v39 = vpack.c.bf16 %v2688_v47, %v2685_v30 }
 0xab6   : > { %3481 = vmatmul.mubr.msk.bf16.vlgmr.msra.gmra.mrb[44].mxu0 %vm2788_vm7, %v2691_v39  ;;  %3482 = vmatmul.mubr.msk.bf16.vlgmr.msra.gmra.mrb[40].mxu1 %vm2788_vm7, %v2691_v39 }
 0xab7   : > { %2950 = vmatprep.mubr.f32.mxu0 %v4032_v12  ;;  %3027 = vmatprep.mubr.f32.mxu1 %v4032_v12 }
 0xb89   : > { %v2826_v44 = vpop.f32.mrb[44].mxu0  ;;  %v2869_v52 = vpop.f32.mrb[40].mxu1 }
 0xb8a   : > { %v2828_v53 = vpop.f32.mrb[45].mxu0  ;;  %v2871_v6 = vpop.f32.mrb[41].mxu1 }
 0xb8b   : > { %v2830_v54 = vpop.f32.mrb[46].mxu0  ;;  %v2873_v26 = vpop.f32.mrb[42].mxu1 }
 0xb8c   : > { %v3758_v56 = vpack.c.bf16 %v2830_v54, %v2826_v44  ;;  %v3762_v57 = vpack.c.bf16 %v2873_v26, %v2869_v52  ;;  %v2832_v58 = vpop.f32.mrb[47].mxu0  ;;  %v2875_v60 = vpop.f32.mrb[43].mxu1 }
 0xb8d   : > { %v3756_v28 = vpack.c.bf16 %v2832_v58, %v2828_v53  ;;  %v3760_v20 = vpack.c.bf16 %v2875_v60, %v2871_v6 }
 0xb8f   : > { %3757 = vmatprep.subr.bf16.mxu0 %v3756_v28  ;;  %3761 = vmatprep.subr.bf16.mxu1 %v3760_v20 }
 0xb90   : > { %3759 = vmatpush1.bf16.msra.mxu0 %v3758_v56  ;;  %3763 = vmatpush1.bf16.msra.mxu1 %v3762_v57 }
 0xb93   : > { %3483 = vmatmul.mubr.msk.f32.vlgmr.msra.gmra.mrb[48].mxu0 %vm1319_vm1, %v2878_v32  ;;  %3485 = vmatmul.mubr.msk.f32.vlgmr.msra.gmra.mrb[44].mxu1 %vm1319_vm1, %v2878_v32 }
 0xb94   : > { %2956 = vmatprep.mubr.f32.mxu0 %v4032_v12  ;;  %3033 = vmatprep.mubr.f32.mxu1 %v4032_v12 }
 0xb97   : > { %3484 = vmatmul.mubr.msk.f32.gmra.mrb[50].mxu0 %vm1319_vm1, %v2879_v16  ;;  %3486 = vmatmul.mubr.msk.f32.gmra.mrb[46].mxu1 %vm1319_vm1, %v2879_v16 }
 0xb98   : > { %3133 = vmatprep.mubr.f32.mxu0 %v4032_v12  ;;  %3210 = vmatprep.mubr.f32.mxu1 %v4032_v12 }
 0xc66   : > { %v2952_v10 = vpop.f32.mrb[48].mxu0  ;;  %v3029_v50 = vpop.f32.mrb[44].mxu1 }
 0xc67   : > { %v2954_v35 = vpop.f32.mrb[49].mxu0  ;;  %v3031_v48 = vpop.f32.mrb[45].mxu1 }
 0xc68   : > { %v3040_v18 = vadd.f32 %v2954_v35, %v2952_v10 }
 0xc6a   : > { %v3041_v8 = vadd.f32 %v3040_v18, %v3029_v50  ;;  %v2958_v1 = vpop.f32.mrb[50].mxu0  ;;  %v3035_v40 = vpop.f32.mrb[46].mxu1 }
 0xc6b   : > { %v2960_v34 = vpop.f32.mrb[51].mxu0  ;;  %v3037_v0 = vpop.f32.mrb[47].mxu1 }
 0xc6c   : > { %v3042_v4 = vadd.f32 %v3041_v8, %v3031_v48  ;;  %v3045_v29 = vadd.f32 %v2960_v34, %v2958_v1 }
 0xc6e   : > { %v3046_v7 = vadd.f32 %v3045_v29, %v3035_v40  ;;  %3043 = vadd.xlane.f32.xlu1 %v3042_v4 }
 0xc70   : > { %v3047_v3 = vadd.f32 %v3046_v7, %v3037_v0 }
 0xc72   : > { %3048 = vadd.xlane.f32.xlu0 %v3047_v3 }
 0xc7f   : > { %3256 = vperm.xlu1 %3788, %v3248_v9  }
 0xc88   : > { %3251 = vperm.xlu0 %3787, %v3247_v31  }
 0xcfb   : > { %v3044_v37 = vpop.xlane.xlu1 %3043 }
 0xcfc   : > { %v3051_v11 = vmul.f32 0.0009765625, %v3044_v37 }
 0xcfe   : > { %v4910_v42 = vsub.f32 %v2826_v44, %v3051_v11  ;;  %v4912_v49 = vsub.f32 %v2869_v52, %v3051_v11  ;;  %v3054_v43 = vsub.f32 %v2828_v53, %v3051_v11  ;;  %v3056_v62 = vsub.f32 %v2871_v6, %v3051_v11 }
 0xcff   : > { %v3049_v13 = vpop.xlane.xlu0 %3048  ;;  %v3257_v57 = vpop.permute.xlu1 %3256 }
 0xd00   : > { %v3052_v14 = vmul.f32 0.0009765625, %v3049_v13  ;;  %v3062_v22 = vmul.f32 %v3054_v43, %v3054_v43  ;;  %v3064_v41 = vmul.f32 %v3056_v62, %v3056_v62  ;;  %v3061_v24 = vmul.f32 %v4910_v42, %v4910_v42 }
 0xd01   : > { %v3063_v25 = vmul.f32 %v4912_v49, %v4912_v49 }
 0xd02   : > { %v4914_v46 = vsub.f32 %v2830_v54, %v3052_v14  ;;  %v4916_v55 = vsub.f32 %v2873_v26, %v3052_v14  ;;  %v4918_v17 = vsub.f32 %v2832_v58, %v3052_v14  ;;  %v4920_v19 = vsub.f32 %v2875_v60, %v3052_v14  ;;  %v3268_v26 = vld [vmem:[%s4994_s16 + $0x8] sm:$0xff]  ;;  %v4018_v14 = vld [vmem:[%s4245_s23 + $0x10] sm:$0xff] }
 0xd04   : > { %v3066_v59 = vmul.f32 %v4918_v17, %v4918_v17  ;;  %v3068_v2 = vmul.f32 %v4920_v19, %v4920_v19  ;;  %v3065_v63 = vmul.f32 %v4914_v46, %v4914_v46  ;;  %v3067_v36 = vmul.f32 %v4916_v55, %v4916_v55 }
 0xd06   : > { %v3764_v38 = vpack.c.bf16 %v3066_v59, %v3062_v22  ;;  %v3768_v15 = vpack.c.bf16 %v3068_v2, %v3064_v41  ;;  %v3766_v23 = vpack.c.bf16 %v3065_v63, %v3061_v24  ;;  %v3770_v33 = vpack.c.bf16 %v3067_v36, %v3063_v25  ;;  %v4019_v41 = vld [vmem:[%s4245_s23 + $0x18] sm:$0xff] }
 0xd07   : > { %v3252_v56 = vpop.permute.xlu0 %3251 }
 0xd08   : > { %3765 = vmatprep.subr.bf16.mxu0 %v3764_v38  ;;  %3769 = vmatprep.subr.bf16.mxu1 %v3768_v15  ;;  %v4020_v38 = vld [vmem:[%s4245_s23 + $0x20] sm:$0xff] }
 0xd09   : > { %3767 = vmatpush1.bf16.msra.mxu0 %v3766_v23  ;;  %3771 = vmatpush1.bf16.msra.mxu1 %v3770_v33  ;;  %v4021_v23 = vld [vmem:[%s4245_s23 + $0x28] sm:$0xff] }
 0xd0c   : > { %3487 = vmatmul.mubr.msk.f32.vlgmr.msra.gmra.mrb[52].mxu0 %vm1319_vm1, %v2878_v32  ;;  %3489 = vmatmul.mubr.msk.f32.vlgmr.msra.gmra.mrb[48].mxu1 %vm1319_vm1, %v2878_v32 }
 0xd0d   : > { %3139 = vmatprep.mubr.f32.mxu0 %v4032_v12  ;;  %3216 = vmatprep.mubr.f32.mxu1 %v4032_v12  ;;  %v3267_v12 = vld [vmem:[%s4994_s16] sm:$0xff] }
 0xd10   : > { %3488 = vmatmul.mubr.msk.f32.gmra.mrb[54].mxu0 %vm1319_vm1, %v2879_v16  ;;  %3490 = vmatmul.mubr.msk.f32.gmra.mrb[50].mxu1 %vm1319_vm1, %v2879_v16 }
 0xddf   : > { %v3135_v27 = vpop.f32.mrb[52].mxu0  ;;  %v3212_v21 = vpop.f32.mrb[48].mxu1 }
 0xde0   : > { %v3137_v61 = vpop.f32.mrb[53].mxu0  ;;  %v3214_v5 = vpop.f32.mrb[49].mxu1 }
 0xde1   : > { %v3223_v45 = vadd.f32 %v3137_v61, %v3135_v27  ;;  %v4022_v27 = vld [vmem:[%s4245_s23 + $0x30] sm:$0xff]  ;;  %v4023_v61 = vld [vmem:[%s4245_s23 + $0x38] sm:$0xff] }
 0xde3   : > { %v3224_v30 = vadd.f32 %v3223_v45, %v3212_v21  ;;  %v3141_v47 = vpop.f32.mrb[54].mxu0  ;;  %v3218_v51 = vpop.f32.mrb[50].mxu1 }
 0xde4   : > { %v3143_v39 = vpop.f32.mrb[55].mxu0  ;;  %v3220_v44 = vpop.f32.mrb[51].mxu1 }
 0xde5   : > { %v3228_v52 = vadd.f32 %v3143_v39, %v3141_v47  ;;  %v3225_v53 = vadd.f32 %v3224_v30, %v3214_v5 }
 0xde7   : > { %v3229_v6 = vadd.f32 %v3228_v52, %v3218_v51  ;;  %3226 = vadd.xlane.f32.xlu0 %v3225_v53 }
 0xde9   : > { %v3230_v54 = vadd.f32 %v3229_v6, %v3220_v44 }
 0xdeb   : > { %3231 = vadd.xlane.f32.xlu1 %v3230_v54 }
 0xdfc   : > { %3271 = vperm.xlu1 %3788, %v3267_v12  }
 0xdfd   : > { %3276 = vperm.xlu0 %3787, %v3268_v26  }
 0xe74   : > { %v3227_v58 = vpop.xlane.xlu0 %3226 }
 0xe75   : > { %v3233_v60 = vmul.f32 0.0009765625, %v3227_v58 }
 0xe77   : > { %v3235_v28 = vadd.f32 1e-05, %v3233_v60 }
 0xe78   : > { %v3232_v20 = vpop.xlane.xlu1 %3231 }
 0xe79   : > { %4012 = vrsqrt.f32 %v3235_v28  ;;  %v3234_v32 = vmul.f32 0.0009765625, %v3232_v20 }
 0xe7b   : > { %v3236_v16 = vadd.f32 1e-05, %v3234_v32 }
 0xe7c   : > { %v3272_v4 = vpop.permute.xlu1 %3271 }
 0xe7d   : > { %4014 = vrsqrt.f32 %v3236_v16 }
 0xe83   : > { %v4013_v10 = vpop.eup %4012 }
 0xe84   : > { %v3239_v50 = vmul.f32 %v4013_v10, %v4910_v42  ;;  %v3240_v35 = vmul.f32 %v4013_v10, %v3054_v43  ;;  %v3241_v48 = vmul.f32 %v4013_v10, %v4912_v49  ;;  %v3242_v18 = vmul.f32 %v4013_v10, %v3056_v62  ;;  %v4016_v49 = vld [vmem:[%s4245_s23] sm:$0xff]  ;;  %v4017_v43 = vld [vmem:[%s4245_s23 + $0x8] sm:$0xff] }
 0xe86   : > { %v3259_v8 = vmul.f32 %v3252_v56, %v3239_v50  ;;  %v3260_v1 = vmul.f32 %v3252_v56, %v3240_v35  ;;  %v3261_v40 = vmul.f32 %v3252_v56, %v3241_v48  ;;  %v3262_v34 = vmul.f32 %v3252_v56, %v3242_v18 }
 0xe87   : > { %v4015_v0 = vpop.eup %4014 }
 0xe88   : > { %v3279_v29 = vadd.f32 %v3272_v4, %v3259_v8  ;;  %v3280_v7 = vadd.f32 %v3272_v4, %v3260_v1  ;;  %v3281_v3 = vadd.f32 %v3272_v4, %v3261_v40  ;;  %v3282_v9 = vadd.f32 %v3272_v4, %v3262_v34 }
 0xe89   : > { %v3243_v31 = vmul.f32 %v4015_v0, %v4914_v46  ;;  %v3244_v37 = vmul.f32 %v4015_v0, %v4918_v17  ;;  %v3245_v11 = vmul.f32 %v4015_v0, %v4916_v55  ;;  %v3246_v42 = vmul.f32 %v4015_v0, %v4920_v19  ;;  %v3277_v55 = vpop.permute.xlu0 %3276 }
 0xe8a   : > { %v3287_v13 = vadd.f32 %v4016_v49, %v3279_v29  ;;  %v3288_v62 = vadd.f32 %v4017_v43, %v3280_v7  ;;  %v3289_v22 = vadd.f32 %v4018_v14, %v3281_v3  ;;  %v3290_v24 = vadd.f32 %v4019_v41, %v3282_v9 }
 0xe8b   : > { %v3263_v46 = vmul.f32 %v3257_v57, %v3243_v31  ;;  %v3264_v25 = vmul.f32 %v3257_v57, %v3244_v37  ;;  %v3265_v17 = vmul.f32 %v3257_v57, %v3245_v11  ;;  %v3266_v59 = vmul.f32 %v3257_v57, %v3246_v42 }
 0xe8c   : > { %3295 = vst [vmem:[%s4953_s24] sm:$0xff] %v3287_v13  ;;  %3296 = vst [vmem:[%s4953_s24 + $0x8] sm:$0xff] %v3288_v62 }
 0xe8d   : > { %3297 = vst [vmem:[%s4953_s24 + $0x10] sm:$0xff] %v3289_v22  ;;  %3298 = vst [vmem:[%s4953_s24 + $0x18] sm:$0xff] %v3290_v24  ;;  %v3283_v19 = vadd.f32 %v3277_v55, %v3263_v46  ;;  %v3284_v2 = vadd.f32 %v3277_v55, %v3264_v25  ;;  %v3285_v63 = vadd.f32 %v3277_v55, %v3265_v17 }
 0xe8e   : > { %v3286_v36 = vadd.f32 %v3277_v55, %v3266_v59 }
 0xe8f   : > { %v3291_v15 = vadd.f32 %v4020_v38, %v3283_v19  ;;  %v3292_v33 = vadd.f32 %v4021_v23, %v3284_v2  ;;  %v3293_v21 = vadd.f32 %v4022_v27, %v3285_v63 }
 0xe90   : > { %v3294_v5 = vadd.f32 %v4023_v61, %v3286_v36 }
 0xe91   : > { %3299 = vst [vmem:[%s4953_s24 + $0x20] sm:$0xff] %v3291_v15  ;;  %3300 = vst [vmem:[%s4953_s24 + $0x28] sm:$0xff] %v3292_v33 }
 0xe92   : > { %3301 = vst [vmem:[%s4953_s24 + $0x30] sm:$0xff] %v3293_v21  ;;  %3302 = vst [vmem:[%s4953_s24 + $0x38] sm:$0xff] %v3294_v5 }
 0xe93 PF: > { %s29_s0 = sadd.s32 1, %s4030_s0  }
 0xe94   : > { %p26_p4 = scmp.ge.s32.totalorder %s29_s0, 4  }
 0xe96   :  { %28 = sbr.rel (!%p26_p4) target bundleno = 5 (0x5), region = 126 }

</bundles_post_ra>
